<compile_context>
chip_gen: v5e
topology: v5e:2x2
jax: 0.10.0
libtpu: 0.0.40
codegen_flags: <defaults>
</compile_context>

<pallas_src>
import functools

import jax
import jax.numpy as jnp
from jax.experimental import pallas as pl
from jax.experimental.pallas import tpu as pltpu


# ---------------------------------------------------------------------------
# helpers
# ---------------------------------------------------------------------------
def _layer_norm(x, g, b, eps=1e-5):
    mu = jnp.mean(x, axis=-1, keepdims=True)
    var = jnp.mean(jnp.square(x - mu), axis=-1, keepdims=True)
    return (x - mu) * jax.lax.rsqrt(var + eps) * g + b


def _vmem_limit_bytes():
    """Generation-aware scoped-VMEM budget."""
    try:
        cap = pltpu.get_tpu_info().vmem_capacity_bytes
    except Exception:  # not on TPU / old jax: stay conservative
        cap = 0
    if cap >= 100 * 1024 * 1024:
        return 96 * 1024 * 1024      # v5e / v6e (128 MiB physical)
    if cap > 0:
        return 40 * 1024 * 1024      # v7x (64 MiB physical)
    return 32 * 1024 * 1024


def _target_rows():
    return 512 if _vmem_limit_bytes() >= 64 * 1024 * 1024 else 256


def _pick_batch_block(B, T, target_rows):
    """Largest divisor Bb of B with Bb*T <= max(T, target_rows) and >=2 grid
    steps (so both v7x TensorCores are used when B >= 2)."""
    best = 1
    for bb in range(1, B + 1):
        if B % bb:
            continue
        if bb * T > max(T, target_rows):
            continue
        if B >= 2 and B // bb < 2:
            continue
        best = bb
    return best


# ---------------------------------------------------------------------------
# fused transformer stack kernel: grid = (batch_blocks, n_layer)
# ---------------------------------------------------------------------------
def _stack_kernel(n_head, has_mask, *refs):
    if has_mask:
        (x_ref, mask_ref, wq_ref, wk_ref, wv_ref, wproj_ref, bproj_ref,
         g1_ref, b1_ref, g2_ref, b2_ref, w1_ref, bf1_ref, w2_ref, bf2_ref,
         o_ref, attn_sc) = refs
    else:
        mask_ref = None
        (x_ref, wq_ref, wk_ref, wv_ref, wproj_ref, bproj_ref,
         g1_ref, b1_ref, g2_ref, b2_ref, w1_ref, bf1_ref, w2_ref, bf2_ref,
         o_ref, attn_sc) = refs

    f32, bf16 = jnp.float32, jnp.bfloat16
    Bb, T, C = x_ref.shape
    hs = C // n_head
    M = Bb * T

    layer = pl.program_id(1)

    # residual stream lives in the output VMEM block across the layer axis
    @pl.when(layer == 0)
    def _():
        o_ref[...] = x_ref[...]

    x2d = o_ref[...].reshape(M, C)

    # ---- multi-head causal self-attention (pre-LN) ----
    h = _layer_norm(x2d, g1_ref[0], b1_ref[0]).astype(bf16)
    # fused full-width (N = C) bf16 projections; attention scale is already
    # folded into wq at param-prep time.  Cast to bf16 immediately.
    q = jnp.dot(h, wq_ref[0], preferred_element_type=f32).astype(bf16).reshape(Bb, T, C)
    k = jnp.dot(h, wk_ref[0], preferred_element_type=f32).astype(bf16).reshape(Bb, T, C)
    v = jnp.dot(h, wv_ref[0], preferred_element_type=f32).astype(bf16).reshape(Bb, T, C)

    row = jax.lax.broadcasted_iota(jnp.int32, (T, T), 0)
    col = jax.lax.broadcasted_iota(jnp.int32, (T, T), 1)
    causal = (col <= row)[None, :, :]                       # (1, T, T)
    if has_mask:
        allowed = jnp.logical_and(causal, mask_ref[...] != 0)   # (Bb, T, T)
    else:
        allowed = causal
    neg = jnp.float32(-1e30)                                # finite: no NaN rows

    for i in range(n_head):                                 # n_head small; unrolled
        sl = slice(i * hs, (i + 1) * hs)
        qi = q[:, :, sl]
        ki = k[:, :, sl]
        vi = v[:, :, sl]

        s = jnp.einsum("bqd,bkd->bqk", qi, ki,
                       preferred_element_type=f32)          # (Bb, T, T)
        s = jnp.where(allowed, s, neg)
        m = jnp.max(s, axis=-1, keepdims=True)
        e = jnp.exp(s - m)
        denom = jnp.sum(e, axis=-1, keepdims=True)
        p_attn = e * pl.reciprocal(denom, approx=True)

        o_i = jnp.einsum("bqk,bkd->bqd", p_attn.astype(bf16), vi,
                         preferred_element_type=f32)        # (Bb, T, hs)
        # "concat" via lane-offset store into a bf16 scratch (plain vst, no XLU)
        attn_sc[:, sl] = o_i.reshape(M, hs).astype(bf16)

    # single K=C output projection (fills MXU depth)
    sa = jnp.dot(attn_sc[...], wproj_ref[0],
                 preferred_element_type=f32) + bproj_ref[0]
    x2d = x2d + sa

    # ---- feed-forward (pre-LN): Linear(4C) -> ReLU -> Linear(C) ----
    # TODO(synk): tile the 4C hidden dim for very large C on v7x (64 MiB VMEM).
    h2 = _layer_norm(x2d, g2_ref[0], b2_ref[0]).astype(bf16)
    ff = jnp.dot(h2, w1_ref[0], preferred_element_type=f32) + bf1_ref[0]
    ff = jnp.maximum(ff, 0.0).astype(bf16)
    ff = jnp.dot(ff, w2_ref[0], preferred_element_type=f32) + bf2_ref[0]

    o_ref[...] = (x2d + ff).reshape(Bb, T, C)


def transformer_stack(x, mask, layers, n_head):
    B, T, C = x.shape
    n_layer = layers["wq"].shape[0]
    Bb = _pick_batch_block(B, T, _target_rows())
    has_mask = mask is not None
    kernel = functools.partial(_stack_kernel, n_head, has_mask)

    lmap = lambda b, l: (l, 0, 0)     # stacked per-layer weights/biases
    xmap = lambda b, l: (b, 0, 0)     # constant over the layer axis -> 1 DMA/block

    in_specs = [pl.BlockSpec((Bb, T, C), xmap)]
    operands = [x]
    if has_mask:
        in_specs.append(pl.BlockSpec((Bb, T, T), xmap))     # int8 mask
        operands.append(mask)
    in_specs += [
        pl.BlockSpec((1, C, C), lmap),          # wq (scale folded in, bf16)
        pl.BlockSpec((1, C, C), lmap),          # wk
        pl.BlockSpec((1, C, C), lmap),          # wv
        pl.BlockSpec((1, C, C), lmap),          # wproj
        pl.BlockSpec((1, 1, C), lmap),          # bproj
        pl.BlockSpec((1, 1, C), lmap),          # ln1 gamma
        pl.BlockSpec((1, 1, C), lmap),          # ln1 beta
        pl.BlockSpec((1, 1, C), lmap),          # ln2 gamma
        pl.BlockSpec((1, 1, C), lmap),          # ln2 beta
        pl.BlockSpec((1, C, 4 * C), lmap),      # ffn w1
        pl.BlockSpec((1, 1, 4 * C), lmap),      # ffn b1
        pl.BlockSpec((1, 4 * C, C), lmap),      # ffn w2
        pl.BlockSpec((1, 1, C), lmap),          # ffn b2
    ]
    operands += [layers[k] for k in
                 ("wq", "wk", "wv", "wproj", "bproj",
                  "g1", "b1", "g2", "b2", "w1", "bf1", "w2", "bf2")]

    return pl.pallas_call(
        kernel,
        out_shape=jax.ShapeDtypeStruct((B, T, C), jnp.float32),
        grid=(B // Bb, n_layer),
        in_specs=in_specs,
        out_specs=pl.BlockSpec((Bb, T, C), xmap),
        scratch_shapes=[pltpu.VMEM((Bb * T, C), jnp.bfloat16)],   # head concat
        compiler_params=pltpu.CompilerParams(
            dimension_semantics=("parallel", "arbitrary"),
            vmem_limit_bytes=_vmem_limit_bytes()),
    )(*operands)


# ---------------------------------------------------------------------------
# final LayerNorm + lm_head kernel (LN cached across vocab tiles)
# ---------------------------------------------------------------------------
def _final_kernel(x_ref, g_ref, b_ref, w_ref, bias_ref, o_ref, h_sc):
    Bb, T, C = x_ref.shape

    @pl.when(pl.program_id(1) == 0)          # compute LN once per batch block
    def _():
        x2d = x_ref[...].reshape(Bb * T, C)
        h_sc[...] = _layer_norm(x2d, g_ref[...], b_ref[...]).astype(jnp.bfloat16)

    logits = jnp.dot(h_sc[...], w_ref[...],
                     preferred_element_type=jnp.float32) + bias_ref[...]
    o_ref[...] = logits.reshape(Bb, T, -1).astype(o_ref.dtype)


def final_head(x, params, logits_dtype=jnp.float32):
    # TODO(synk): pass logits_dtype=jnp.bfloat16 to halve the (B,T,V) HBM write
    #             when the caller tolerates bf16 logits.
    B, T, C = x.shape
    V = params["w_lm"].shape[1]
    Bb = _pick_batch_block(B, T, _target_rows())
    TV = V if V <= 4096 else 2048            # stream vocab tiles for big vocabs
    grid = (B // Bb, pl.cdiv(V, TV))
    return pl.pallas_call(
        _final_kernel,
        out_shape=jax.ShapeDtypeStruct((B, T, V), logits_dtype),
        grid=grid,
        in_specs=[
            pl.BlockSpec((Bb, T, C), lambda b, v: (b, 0, 0)),
            pl.BlockSpec((1, C), lambda b, v: (0, 0)),
            pl.BlockSpec((1, C), lambda b, v: (0, 0)),
            pl.BlockSpec((C, TV), lambda b, v: (0, v)),
            pl.BlockSpec((1, TV), lambda b, v: (0, v)),
        ],
        out_specs=pl.BlockSpec((Bb, T, TV), lambda b, v: (b, 0, v)),
        scratch_shapes=[pltpu.VMEM((Bb * T, C), jnp.bfloat16)],   # LN cache
        compiler_params=pltpu.CompilerParams(
            # vocab axis must be sequential ("arbitrary") so the LN cache,
            # written only at vocab tile 0, is valid for later tiles.
            dimension_semantics=("parallel", "arbitrary"),
            vmem_limit_bytes=_vmem_limit_bytes()),
    )(x, params["g_f"], params["b_f"], params["w_lm"], params["b_lm"])


# ---------------------------------------------------------------------------
# deterministic parameter init (shapes/semantics match the PyTorch module;
# matmul weights stored bf16, norms/biases/embeddings f32, per-layer weights
# stacked along a leading n_layer axis)
# ---------------------------------------------------------------------------
def init_params(key, vocab_size, n_embd, n_head, n_layer, block_size):
    hs = n_embd // n_head
    f32, bf16 = jnp.float32, jnp.bfloat16
    keys = jax.random.split(key, 3 + n_layer)
    # NOTE: the reference scales attention scores by n_embd ** -0.5 (the C of
    # the *input*), not head_size ** -0.5 -- reproduced exactly, and folded
    # into wq here (free at param-prep time).
    scale = float(n_embd) ** -0.5

    params = {
        "n_head": n_head,
        "tok_emb": 0.02 * jax.random.normal(keys[0], (vocab_size, n_embd), f32),
        "pos_emb": 0.02 * jax.random.normal(keys[1], (block_size, n_embd), f32),
        # xavier-normal lm_head, zero bias
        "w_lm": (((2.0 / (n_embd + vocab_size)) ** 0.5)
                 * jax.random.normal(keys[2], (n_embd, vocab_size), f32)).astype(bf16),
        "b_lm": jnp.zeros((1, vocab_size), f32),
        "g_f": jnp.ones((1, n_embd), f32),
        "b_f": jnp.zeros((1, n_embd), f32),
    }

    std_attn = (2.0 / (n_embd + hs)) ** 0.5    # xavier normal per-head q/k/v
    std_proj = (2.0 / (2 * n_embd)) ** 0.5     # xavier normal for proj
    std_ff1 = (2.0 / n_embd) ** 0.5            # kaiming normal (relu, fan_in)
    std_ff2 = (2.0 / (4 * n_embd)) ** 0.5

    names = ("wq", "wk", "wv", "wproj", "bproj", "g1", "b1", "g2", "b2",
             "w1", "bf1", "w2", "bf2")
    acc = {n: [] for n in names}
    for l in range(n_layer):
        lk = jax.random.split(keys[3 + l], 6)
        # head i occupies columns/rows [i*hs:(i+1)*hs] of the fused weights
        acc["wq"].append((scale * std_attn *
                          jax.random.normal(lk[0], (n_embd, n_embd), f32)).astype(bf16))
        acc["wk"].append((std_attn *
                          jax.random.normal(lk[1], (n_embd, n_embd), f32)).astype(bf16))
        acc["wv"].append((std_attn *
                          jax.random.normal(lk[2], (n_embd, n_embd), f32)).astype(bf16))
        acc["wproj"].append((std_proj *
                             jax.random.normal(lk[3], (n_embd, n_embd), f32)).astype(bf16))
        acc["bproj"].append(jnp.zeros((1, n_embd), f32))
        acc["g1"].append(jnp.ones((1, n_embd), f32))
        acc["b1"].append(jnp.zeros((1, n_embd), f32))
        acc["g2"].append(jnp.ones((1, n_embd), f32))
        acc["b2"].append(jnp.zeros((1, n_embd), f32))
        acc["w1"].append((std_ff1 *
                          jax.random.normal(lk[4], (n_embd, 4 * n_embd), f32)).astype(bf16))
        acc["bf1"].append(jnp.zeros((1, 4 * n_embd), f32))
        acc["w2"].append((std_ff2 *
                          jax.random.normal(lk[5], (4 * n_embd, n_embd), f32)).astype(bf16))
        acc["bf2"].append(jnp.zeros((1, n_embd), f32))
    params["layers"] = {n: jnp.stack(v, axis=0) for n, v in acc.items()}
    return params


# ---------------------------------------------------------------------------
# full forward pass (embedding glue in plain JAX, heavy lifting in Pallas)
# ---------------------------------------------------------------------------
def model_forward(params, idx, attention_mask=None, logits_dtype=jnp.float32):
    B, T = idx.shape
    tok_emb = params["tok_emb"][idx]              # (B, T, C)
    pos_emb = params["pos_emb"][:T]               # (T, C)
    x = (tok_emb + pos_emb).astype(jnp.float32)   # dropout is identity at inference

    if attention_mask is not None:
        # int8 mask: 4x less DMA than f32; reference semantics (mask == 0 -> -inf)
        mask = (attention_mask[:, :T, :T] != 0).astype(jnp.int8)
    else:
        mask = None                               # no-mask variant: no mask DMA at all

    x = transformer_stack(x, mask, params["layers"], params["n_head"])
    logits = final_head(x, params, logits_dtype=logits_dtype)
    # TODO(synk): cross-entropy loss path (targets != None) left to plain JAX callers.
    return logits, None


# ---------------------------------------------------------------------------
# pure-JAX reference (f32 math on the same bf16-stored weights) for sanity
# ---------------------------------------------------------------------------
def _reference_forward(params, idx):
    f32 = jnp.float32
    L = params["layers"]
    n_head = params["n_head"]
    B, T = idx.shape
    x = params["tok_emb"][idx] + params["pos_emb"][:T]
    C = x.shape[-1]
    hs = C // n_head
    n_layer = L["wq"].shape[0]
    causal = jnp.tril(jnp.ones((T, T), bool))
    for l in range(n_layer):
        h = _layer_norm(x, L["g1"][l], L["b1"][l])
        q = h @ L["wq"][l].astype(f32)            # scale already folded into wq
        k = h @ L["wk"][l].astype(f32)
        v = h @ L["wv"][l].astype(f32)
        outs = []
        for i in range(n_head):
            sl = slice(i * hs, (i + 1) * hs)
            s = jnp.einsum("btd,bsd->bts", q[..., sl], k[..., sl])
            s = jnp.where(causal, s, -jnp.inf)
            p = jax.nn.softmax(s, axis=-1)
            outs.append(jnp.einsum("bts,bsd->btd", p, v[..., sl]))
        sa = jnp.concatenate(outs, -1) @ L["wproj"][l].astype(f32) + L["bproj"][l]
        x = x + sa
        h2 = _layer_norm(x, L["g2"][l], L["b2"][l])
        ff = jnp.maximum(h2 @ L["w1"][l].astype(f32) + L["bf1"][l], 0.0)
        ff = ff @ L["w2"][l].astype(f32) + L["bf2"][l]
        x = x + ff
    h = _layer_norm(x, params["g_f"], params["b_f"])
    return h @ params["w_lm"].astype(f32) + params["b_lm"]


if __name__ == "__main__":
    vocab_size, n_embd, n_head, n_layer, block_size = 64, 32, 4, 2, 8
    B, T = 2, 8

    key = jax.random.PRNGKey(0)
    pkey, ikey = jax.random.split(key)
    params = init_params(pkey, vocab_size, n_embd, n_head, n_layer, block_size)
    idx = jax.random.randint(ikey, (B, T), 0, vocab_size, dtype=jnp.int32)

    logits, loss = model_forward(params, idx, attention_mask=None)
    logits = jax.block_until_ready(logits)

    assert logits.shape == (B, T, vocab_size)
    assert logits.dtype == jnp.float32
    ref = _reference_forward(params, idx)
    err = float(jnp.max(jnp.abs(logits - ref)))
    assert err < 1e-1, f"max abs error vs reference too large: {err}"
    print("KERNEL_OK")
</pallas_src>

<mosaic_0001>
module attributes {stable_mosaic.version = 11 : i64} {
  func.func @_stack_kernel(%arg0: i32, %arg1: i32, %arg2: memref<1x8x32xf32, #tpu.memory_space<vmem>>, %arg3: memref<1x32x32xbf16, #tpu.memory_space<vmem>>, %arg4: memref<1x32x32xbf16, #tpu.memory_space<vmem>>, %arg5: memref<1x32x32xbf16, #tpu.memory_space<vmem>>, %arg6: memref<1x32x32xbf16, #tpu.memory_space<vmem>>, %arg7: memref<1x1x32xf32, #tpu.memory_space<vmem>>, %arg8: memref<1x1x32xf32, #tpu.memory_space<vmem>>, %arg9: memref<1x1x32xf32, #tpu.memory_space<vmem>>, %arg10: memref<1x1x32xf32, #tpu.memory_space<vmem>>, %arg11: memref<1x1x32xf32, #tpu.memory_space<vmem>>, %arg12: memref<1x32x128xbf16, #tpu.memory_space<vmem>>, %arg13: memref<1x1x128xf32, #tpu.memory_space<vmem>>, %arg14: memref<1x128x32xbf16, #tpu.memory_space<vmem>>, %arg15: memref<1x1x32xf32, #tpu.memory_space<vmem>>, %arg16: memref<1x8x32xf32, #tpu.memory_space<vmem>>, %arg17: memref<8x32xbf16, #tpu.memory_space<vmem>>) attributes {dimension_semantics = [#tpu.dimension_semantics<parallel>, #tpu.dimension_semantics<arbitrary>], iteration_bounds = array<i64: 2, 2>, scalar_prefetch = 0 : i64, scratch_operands = 1 : i64, tpu.core_type = #tpu.core_type<tc>, window_params = [{transform_indices = @transform_0, window_bounds = array<i64: 1, 8, 32>}, {transform_indices = @transform_1, window_bounds = array<i64: 1, 32, 32>}, {transform_indices = @transform_2, window_bounds = array<i64: 1, 32, 32>}, {transform_indices = @transform_3, window_bounds = array<i64: 1, 32, 32>}, {transform_indices = @transform_4, window_bounds = array<i64: 1, 32, 32>}, {transform_indices = @transform_5, window_bounds = array<i64: 1, 1, 32>}, {transform_indices = @transform_6, window_bounds = array<i64: 1, 1, 32>}, {transform_indices = @transform_7, window_bounds = array<i64: 1, 1, 32>}, {transform_indices = @transform_8, window_bounds = array<i64: 1, 1, 32>}, {transform_indices = @transform_9, window_bounds = array<i64: 1, 1, 32>}, {transform_indices = @transform_10, window_bounds = array<i64: 1, 32, 128>}, {transform_indices = @transform_11, window_bounds = array<i64: 1, 1, 128>}, {transform_indices = @transform_12, window_bounds = array<i64: 1, 128, 32>}, {transform_indices = @transform_13, window_bounds = array<i64: 1, 1, 32>}, {transform_indices = @transform_14, window_bounds = array<i64: 1, 8, 32>}]} {
    %c0_i32 = arith.constant 0 : i32
    %0 = arith.cmpi eq, %arg1, %c0_i32 : i32
    %1 = arith.extui %0 : i1 to i32
    %c0_i32_0 = arith.constant 0 : i32
    %2 = arith.cmpi ne, %1, %c0_i32_0 : i32
    scf.if %2 {
      %c0_88 = arith.constant 0 : index
      %c0_89 = arith.constant 0 : index
      %c0_90 = arith.constant 0 : index
      %191 = vector.load %arg2[%c0_88, %c0_89, %c0_90] : memref<1x8x32xf32, #tpu.memory_space<vmem>>, vector<1x8x32xf32>
      %c0_91 = arith.constant 0 : index
      %c0_92 = arith.constant 0 : index
      %c0_93 = arith.constant 0 : index
      %192 = vector.load %arg16[%c0_91, %c0_92, %c0_93] : memref<1x8x32xf32, #tpu.memory_space<vmem>>, vector<1x8x32xf32>
      tpu.vector_store %arg16[%c0_91, %c0_92, %c0_93], %191 {strides = array<i32>} : memref<1x8x32xf32, #tpu.memory_space<vmem>>, vector<1x8x32xf32>,
    } else {
    }
    %c0 = arith.constant 0 : index
    %c0_1 = arith.constant 0 : index
    %c0_2 = arith.constant 0 : index
    %3 = vector.load %arg16[%c0, %c0_1, %c0_2] : memref<1x8x32xf32, #tpu.memory_space<vmem>>, vector<1x8x32xf32>
    %4 = vector.shape_cast %3 : vector<1x8x32xf32> to vector<8x32xf32>
    %c0_3 = arith.constant 0 : index
    %c0_4 = arith.constant 0 : index
    %c0_5 = arith.constant 0 : index
    %5 = vector.load %arg8[%c0_3, %c0_4, %c0_5] : memref<1x1x32xf32, #tpu.memory_space<vmem>>, vector<1x1x32xf32>
    %6 = vector.shape_cast %5 : vector<1x1x32xf32> to vector<1x32xf32>
    %c0_6 = arith.constant 0 : index
    %c0_7 = arith.constant 0 : index
    %c0_8 = arith.constant 0 : index
    %7 = vector.load %arg9[%c0_6, %c0_7, %c0_8] : memref<1x1x32xf32, #tpu.memory_space<vmem>>, vector<1x1x32xf32>
    %8 = vector.shape_cast %7 : vector<1x1x32xf32> to vector<1x32xf32>
    %cst = arith.constant dense<0.000000e+00> : vector<8xf32>
    %9 = vector.multi_reduction <add>, %4, %cst [1] : vector<8x32xf32> to vector<8xf32>
    %10 = vector.shape_cast %9 : vector<8xf32> to vector<8x1xf32>
    %cst_9 = arith.constant 3.200000e+01 : f32
    %11 = vector.broadcast %cst_9 : f32 to vector<8x1xf32>
    %12 = arith.divf %10, %11 : vector<8x1xf32>
    %13 = vector.broadcast %12 : vector<8x1xf32> to vector<8x32xf32>
    %14 = arith.subf %4, %13 : vector<8x32xf32>
    %15 = arith.mulf %14, %14 : vector<8x32xf32>
    %cst_10 = arith.constant dense<0.000000e+00> : vector<8xf32>
    %16 = vector.multi_reduction <add>, %15, %cst_10 [1] : vector<8x32xf32> to vector<8xf32>
    %17 = vector.shape_cast %16 : vector<8xf32> to vector<8x1xf32>
    %cst_11 = arith.constant 3.200000e+01 : f32
    %18 = vector.broadcast %cst_11 : f32 to vector<8x1xf32>
    %19 = arith.divf %17, %18 : vector<8x1xf32>
    %20 = vector.broadcast %12 : vector<8x1xf32> to vector<8x32xf32>
    %21 = arith.subf %4, %20 : vector<8x32xf32>
    %cst_12 = arith.constant 9.99999974E-6 : f32
    %22 = vector.broadcast %cst_12 : f32 to vector<8x1xf32>
    %23 = arith.addf %19, %22 : vector<8x1xf32>
    %24 = math.rsqrt %23 : vector<8x1xf32>
    %25 = vector.broadcast %24 : vector<8x1xf32> to vector<8x32xf32>
    %26 = arith.mulf %21, %25 : vector<8x32xf32>
    %27 = vector.broadcast %6 : vector<1x32xf32> to vector<8x32xf32>
    %28 = arith.mulf %26, %27 : vector<8x32xf32>
    %29 = vector.broadcast %8 : vector<1x32xf32> to vector<8x32xf32>
    %30 = arith.addf %28, %29 : vector<8x32xf32>
    %31 = arith.truncf %30 : vector<8x32xf32> to vector<8x32xbf16>
    %c0_13 = arith.constant 0 : index
    %c0_14 = arith.constant 0 : index
    %c0_15 = arith.constant 0 : index
    %32 = vector.load %arg3[%c0_13, %c0_14, %c0_15] : memref<1x32x32xbf16, #tpu.memory_space<vmem>>, vector<1x32x32xbf16>
    %33 = vector.shape_cast %32 : vector<1x32x32xbf16> to vector<32x32xbf16>
    %cst_16 = arith.constant dense<0.000000e+00> : vector<8x32xf32>
    %34 = tpu.matmul %31, %33, %cst_16 {dimension_numbers = #tpu.dot_dimension_numbers<[1], [0], [0], [1], [0, 0, 1, 1], [], []>} : vector<8x32xbf16>, vector<32x32xbf16>, vector<8x32xf32> -> vector<8x32xf32>
    %35 = arith.truncf %34 : vector<8x32xf32> to vector<8x32xbf16>
    %36 = vector.shape_cast %35 : vector<8x32xbf16> to vector<1x8x32xbf16>
    %c0_17 = arith.constant 0 : index
    %c0_18 = arith.constant 0 : index
    %c0_19 = arith.constant 0 : index
    %37 = vector.load %arg4[%c0_17, %c0_18, %c0_19] : memref<1x32x32xbf16, #tpu.memory_space<vmem>>, vector<1x32x32xbf16>
    %38 = vector.shape_cast %37 : vector<1x32x32xbf16> to vector<32x32xbf16>
    %cst_20 = arith.constant dense<0.000000e+00> : vector<8x32xf32>
    %39 = tpu.matmul %31, %38, %cst_20 {dimension_numbers = #tpu.dot_dimension_numbers<[1], [0], [0], [1], [0, 0, 1, 1], [], []>} : vector<8x32xbf16>, vector<32x32xbf16>, vector<8x32xf32> -> vector<8x32xf32>
    %40 = arith.truncf %39 : vector<8x32xf32> to vector<8x32xbf16>
    %41 = vector.shape_cast %40 : vector<8x32xbf16> to vector<1x8x32xbf16>
    %c0_21 = arith.constant 0 : index
    %c0_22 = arith.constant 0 : index
    %c0_23 = arith.constant 0 : index
    %42 = vector.load %arg5[%c0_21, %c0_22, %c0_23] : memref<1x32x32xbf16, #tpu.memory_space<vmem>>, vector<1x32x32xbf16>
    %43 = vector.shape_cast %42 : vector<1x32x32xbf16> to vector<32x32xbf16>
    %cst_24 = arith.constant dense<0.000000e+00> : vector<8x32xf32>
    %44 = tpu.matmul %31, %43, %cst_24 {dimension_numbers = #tpu.dot_dimension_numbers<[1], [0], [0], [1], [0, 0, 1, 1], [], []>} : vector<8x32xbf16>, vector<32x32xbf16>, vector<8x32xf32> -> vector<8x32xf32>
    %45 = arith.truncf %44 : vector<8x32xf32> to vector<8x32xbf16>
    %46 = vector.shape_cast %45 : vector<8x32xbf16> to vector<1x8x32xbf16>
    %47 = tpu.iota {dimensions = array<i32: 0>} : vector<8x8xi32>
    %48 = tpu.iota {dimensions = array<i32: 1>} : vector<8x8xi32>
    %49 = arith.cmpi sle, %48, %47 : vector<8x8xi32>
    %50 = vector.shape_cast %49 : vector<8x8xi1> to vector<1x8x8xi1>
    %51 = vector.extract_strided_slice %36 {offsets = [0, 0, 0], sizes = [1, 8, 8], strides = [1, 1, 1]} : vector<1x8x32xbf16> to vector<1x8x8xbf16>
    %52 = vector.extract_strided_slice %41 {offsets = [0, 0, 0], sizes = [1, 8, 8], strides = [1, 1, 1]} : vector<1x8x32xbf16> to vector<1x8x8xbf16>
    %53 = vector.extract_strided_slice %46 {offsets = [0, 0, 0], sizes = [1, 8, 8], strides = [1, 1, 1]} : vector<1x8x32xbf16> to vector<1x8x8xbf16>
    "tpu.trace_start"() <{level = 10 : i32, message = "bqd,bkd->bqk"}> : () -> ()
    %cst_25 = arith.constant dense<0.000000e+00> : vector<1x8x8xf32>
    %54 = tpu.matmul %51, %52, %cst_25 {dimension_numbers = #tpu.dot_dimension_numbers<[2], [2], [1], [1], [0, 0, 0, 1, 1, 1], [0], [0]>} : vector<1x8x8xbf16>, vector<1x8x8xbf16>, vector<1x8x8xf32> -> vector<1x8x8xf32>
    %cst_26 = arith.constant -1.000000e+30 : f32
    "tpu.trace_stop"() : () -> ()
    %55 = vector.broadcast %cst_26 : f32 to vector<1x8x8xf32>
    %56 = arith.select %50, %54, %55 : vector<1x8x8xi1>, vector<1x8x8xf32>
    %cst_27 = arith.constant dense<0xFF800000> : vector<1x8xf32>
    %57 = vector.multi_reduction <maximumf>, %56, %cst_27 [2] : vector<1x8x8xf32> to vector<1x8xf32>
    %58 = vector.shape_cast %57 : vector<1x8xf32> to vector<1x8x1xf32>
    %59 = vector.broadcast %58 : vector<1x8x1xf32> to vector<1x8x8xf32>
    %60 = arith.subf %56, %59 : vector<1x8x8xf32>
    %61 = math.exp %60 : vector<1x8x8xf32>
    %cst_28 = arith.constant dense<0.000000e+00> : vector<1x8xf32>
    %62 = vector.multi_reduction <add>, %61, %cst_28 [2] : vector<1x8x8xf32> to vector<1x8xf32>
    %63 = vector.shape_cast %62 : vector<1x8xf32> to vector<1x8x1xf32>
    %64 = tpu.reciprocal %63 {approx = true} : vector<1x8x1xf32> -> vector<1x8x1xf32>
    %65 = vector.broadcast %64 : vector<1x8x1xf32> to vector<1x8x8xf32>
    %66 = arith.mulf %61, %65 : vector<1x8x8xf32>
    %67 = arith.truncf %66 : vector<1x8x8xf32> to vector<1x8x8xbf16>
    "tpu.trace_start"() <{level = 10 : i32, message = "bqk,bkd->bqd"}> : () -> ()
    %cst_29 = arith.constant dense<0.000000e+00> : vector<1x8x8xf32>
    %68 = tpu.matmul %67, %53, %cst_29 {dimension_numbers = #tpu.dot_dimension_numbers<[2], [1], [1], [2], [0, 0, 0, 1, 1, 2], [0], [0]>} : vector<1x8x8xbf16>, vector<1x8x8xbf16>, vector<1x8x8xf32> -> vector<1x8x8xf32>
    "tpu.trace_stop"() : () -> ()
    %69 = vector.shape_cast %68 : vector<1x8x8xf32> to vector<8x8xf32>
    %70 = arith.truncf %69 : vector<8x8xf32> to vector<8x8xbf16>
    %c0_30 = arith.constant 0 : index
    %c0_31 = arith.constant 0 : index
    %71 = vector.load %arg17[%c0_30, %c0_31] : memref<8x32xbf16, #tpu.memory_space<vmem>>, vector<8x8xbf16>
    tpu.vector_store %arg17[%c0_30, %c0_31], %70 {strides = array<i32>} : memref<8x32xbf16, #tpu.memory_space<vmem>>, vector<8x8xbf16>,
    %72 = vector.extract_strided_slice %36 {offsets = [0, 0, 8], sizes = [1, 8, 8], strides = [1, 1, 1]} : vector<1x8x32xbf16> to vector<1x8x8xbf16>
    %73 = vector.extract_strided_slice %41 {offsets = [0, 0, 8], sizes = [1, 8, 8], strides = [1, 1, 1]} : vector<1x8x32xbf16> to vector<1x8x8xbf16>
    %74 = vector.extract_strided_slice %46 {offsets = [0, 0, 8], sizes = [1, 8, 8], strides = [1, 1, 1]} : vector<1x8x32xbf16> to vector<1x8x8xbf16>
    "tpu.trace_start"() <{level = 10 : i32, message = "bqd,bkd->bqk"}> : () -> ()
    %cst_32 = arith.constant dense<0.000000e+00> : vector<1x8x8xf32>
    %75 = tpu.matmul %72, %73, %cst_32 {dimension_numbers = #tpu.dot_dimension_numbers<[2], [2], [1], [1], [0, 0, 0, 1, 1, 1], [0], [0]>} : vector<1x8x8xbf16>, vector<1x8x8xbf16>, vector<1x8x8xf32> -> vector<1x8x8xf32>
    %cst_33 = arith.constant -1.000000e+30 : f32
    "tpu.trace_stop"() : () -> ()
    %76 = vector.broadcast %cst_33 : f32 to vector<1x8x8xf32>
    %77 = arith.select %50, %75, %76 : vector<1x8x8xi1>, vector<1x8x8xf32>
    %cst_34 = arith.constant dense<0xFF800000> : vector<1x8xf32>
    %78 = vector.multi_reduction <maximumf>, %77, %cst_34 [2] : vector<1x8x8xf32> to vector<1x8xf32>
    %79 = vector.shape_cast %78 : vector<1x8xf32> to vector<1x8x1xf32>
    %80 = vector.broadcast %79 : vector<1x8x1xf32> to vector<1x8x8xf32>
    %81 = arith.subf %77, %80 : vector<1x8x8xf32>
    %82 = math.exp %81 : vector<1x8x8xf32>
    %cst_35 = arith.constant dense<0.000000e+00> : vector<1x8xf32>
    %83 = vector.multi_reduction <add>, %82, %cst_35 [2] : vector<1x8x8xf32> to vector<1x8xf32>
    %84 = vector.shape_cast %83 : vector<1x8xf32> to vector<1x8x1xf32>
    %85 = tpu.reciprocal %84 {approx = true} : vector<1x8x1xf32> -> vector<1x8x1xf32>
    %86 = vector.broadcast %85 : vector<1x8x1xf32> to vector<1x8x8xf32>
    %87 = arith.mulf %82, %86 : vector<1x8x8xf32>
    %88 = arith.truncf %87 : vector<1x8x8xf32> to vector<1x8x8xbf16>
    "tpu.trace_start"() <{level = 10 : i32, message = "bqk,bkd->bqd"}> : () -> ()
    %cst_36 = arith.constant dense<0.000000e+00> : vector<1x8x8xf32>
    %89 = tpu.matmul %88, %74, %cst_36 {dimension_numbers = #tpu.dot_dimension_numbers<[2], [1], [1], [2], [0, 0, 0, 1, 1, 2], [0], [0]>} : vector<1x8x8xbf16>, vector<1x8x8xbf16>, vector<1x8x8xf32> -> vector<1x8x8xf32>
    "tpu.trace_stop"() : () -> ()
    %90 = vector.shape_cast %89 : vector<1x8x8xf32> to vector<8x8xf32>
    %91 = arith.truncf %90 : vector<8x8xf32> to vector<8x8xbf16>
    %c0_37 = arith.constant 0 : index
    %c8 = arith.constant 8 : index
    %92 = vector.load %arg17[%c0_37, %c8] : memref<8x32xbf16, #tpu.memory_space<vmem>>, vector<8x8xbf16>
    tpu.vector_store %arg17[%c0_37, %c8], %91 {strides = array<i32>} : memref<8x32xbf16, #tpu.memory_space<vmem>>, vector<8x8xbf16>,
    %93 = vector.extract_strided_slice %36 {offsets = [0, 0, 16], sizes = [1, 8, 8], strides = [1, 1, 1]} : vector<1x8x32xbf16> to vector<1x8x8xbf16>
    %94 = vector.extract_strided_slice %41 {offsets = [0, 0, 16], sizes = [1, 8, 8], strides = [1, 1, 1]} : vector<1x8x32xbf16> to vector<1x8x8xbf16>
    %95 = vector.extract_strided_slice %46 {offsets = [0, 0, 16], sizes = [1, 8, 8], strides = [1, 1, 1]} : vector<1x8x32xbf16> to vector<1x8x8xbf16>
    "tpu.trace_start"() <{level = 10 : i32, message = "bqd,bkd->bqk"}> : () -> ()
    %cst_38 = arith.constant dense<0.000000e+00> : vector<1x8x8xf32>
    %96 = tpu.matmul %93, %94, %cst_38 {dimension_numbers = #tpu.dot_dimension_numbers<[2], [2], [1], [1], [0, 0, 0, 1, 1, 1], [0], [0]>} : vector<1x8x8xbf16>, vector<1x8x8xbf16>, vector<1x8x8xf32> -> vector<1x8x8xf32>
    %cst_39 = arith.constant -1.000000e+30 : f32
    "tpu.trace_stop"() : () -> ()
    %97 = vector.broadcast %cst_39 : f32 to vector<1x8x8xf32>
    %98 = arith.select %50, %96, %97 : vector<1x8x8xi1>, vector<1x8x8xf32>
    %cst_40 = arith.constant dense<0xFF800000> : vector<1x8xf32>
    %99 = vector.multi_reduction <maximumf>, %98, %cst_40 [2] : vector<1x8x8xf32> to vector<1x8xf32>
    %100 = vector.shape_cast %99 : vector<1x8xf32> to vector<1x8x1xf32>
    %101 = vector.broadcast %100 : vector<1x8x1xf32> to vector<1x8x8xf32>
    %102 = arith.subf %98, %101 : vector<1x8x8xf32>
    %103 = math.exp %102 : vector<1x8x8xf32>
    %cst_41 = arith.constant dense<0.000000e+00> : vector<1x8xf32>
    %104 = vector.multi_reduction <add>, %103, %cst_41 [2] : vector<1x8x8xf32> to vector<1x8xf32>
    %105 = vector.shape_cast %104 : vector<1x8xf32> to vector<1x8x1xf32>
    %106 = tpu.reciprocal %105 {approx = true} : vector<1x8x1xf32> -> vector<1x8x1xf32>
    %107 = vector.broadcast %106 : vector<1x8x1xf32> to vector<1x8x8xf32>
    %108 = arith.mulf %103, %107 : vector<1x8x8xf32>
    %109 = arith.truncf %108 : vector<1x8x8xf32> to vector<1x8x8xbf16>
    "tpu.trace_start"() <{level = 10 : i32, message = "bqk,bkd->bqd"}> : () -> ()
    %cst_42 = arith.constant dense<0.000000e+00> : vector<1x8x8xf32>
    %110 = tpu.matmul %109, %95, %cst_42 {dimension_numbers = #tpu.dot_dimension_numbers<[2], [1], [1], [2], [0, 0, 0, 1, 1, 2], [0], [0]>} : vector<1x8x8xbf16>, vector<1x8x8xbf16>, vector<1x8x8xf32> -> vector<1x8x8xf32>
    "tpu.trace_stop"() : () -> ()
    %111 = vector.shape_cast %110 : vector<1x8x8xf32> to vector<8x8xf32>
    %112 = arith.truncf %111 : vector<8x8xf32> to vector<8x8xbf16>
    %c0_43 = arith.constant 0 : index
    %c16 = arith.constant 16 : index
    %113 = vector.load %arg17[%c0_43, %c16] : memref<8x32xbf16, #tpu.memory_space<vmem>>, vector<8x8xbf16>
    tpu.vector_store %arg17[%c0_43, %c16], %112 {strides = array<i32>} : memref<8x32xbf16, #tpu.memory_space<vmem>>, vector<8x8xbf16>,
    %114 = vector.extract_strided_slice %36 {offsets = [0, 0, 24], sizes = [1, 8, 8], strides = [1, 1, 1]} : vector<1x8x32xbf16> to vector<1x8x8xbf16>
    %115 = vector.extract_strided_slice %41 {offsets = [0, 0, 24], sizes = [1, 8, 8], strides = [1, 1, 1]} : vector<1x8x32xbf16> to vector<1x8x8xbf16>
    %116 = vector.extract_strided_slice %46 {offsets = [0, 0, 24], sizes = [1, 8, 8], strides = [1, 1, 1]} : vector<1x8x32xbf16> to vector<1x8x8xbf16>
    "tpu.trace_start"() <{level = 10 : i32, message = "bqd,bkd->bqk"}> : () -> ()
    %cst_44 = arith.constant dense<0.000000e+00> : vector<1x8x8xf32>
    %117 = tpu.matmul %114, %115, %cst_44 {dimension_numbers = #tpu.dot_dimension_numbers<[2], [2], [1], [1], [0, 0, 0, 1, 1, 1], [0], [0]>} : vector<1x8x8xbf16>, vector<1x8x8xbf16>, vector<1x8x8xf32> -> vector<1x8x8xf32>
    %cst_45 = arith.constant -1.000000e+30 : f32
    "tpu.trace_stop"() : () -> ()
    %118 = vector.broadcast %cst_45 : f32 to vector<1x8x8xf32>
    %119 = arith.select %50, %117, %118 : vector<1x8x8xi1>, vector<1x8x8xf32>
    %cst_46 = arith.constant dense<0xFF800000> : vector<1x8xf32>
    %120 = vector.multi_reduction <maximumf>, %119, %cst_46 [2] : vector<1x8x8xf32> to vector<1x8xf32>
    %121 = vector.shape_cast %120 : vector<1x8xf32> to vector<1x8x1xf32>
    %122 = vector.broadcast %121 : vector<1x8x1xf32> to vector<1x8x8xf32>
    %123 = arith.subf %119, %122 : vector<1x8x8xf32>
    %124 = math.exp %123 : vector<1x8x8xf32>
    %cst_47 = arith.constant dense<0.000000e+00> : vector<1x8xf32>
    %125 = vector.multi_reduction <add>, %124, %cst_47 [2] : vector<1x8x8xf32> to vector<1x8xf32>
    %126 = vector.shape_cast %125 : vector<1x8xf32> to vector<1x8x1xf32>
    %127 = tpu.reciprocal %126 {approx = true} : vector<1x8x1xf32> -> vector<1x8x1xf32>
    %128 = vector.broadcast %127 : vector<1x8x1xf32> to vector<1x8x8xf32>
    %129 = arith.mulf %124, %128 : vector<1x8x8xf32>
    %130 = arith.truncf %129 : vector<1x8x8xf32> to vector<1x8x8xbf16>
    "tpu.trace_start"() <{level = 10 : i32, message = "bqk,bkd->bqd"}> : () -> ()
    %cst_48 = arith.constant dense<0.000000e+00> : vector<1x8x8xf32>
    %131 = tpu.matmul %130, %116, %cst_48 {dimension_numbers = #tpu.dot_dimension_numbers<[2], [1], [1], [2], [0, 0, 0, 1, 1, 2], [0], [0]>} : vector<1x8x8xbf16>, vector<1x8x8xbf16>, vector<1x8x8xf32> -> vector<1x8x8xf32>
    "tpu.trace_stop"() : () -> ()
    %132 = vector.shape_cast %131 : vector<1x8x8xf32> to vector<8x8xf32>
    %133 = arith.truncf %132 : vector<8x8xf32> to vector<8x8xbf16>
    %c0_49 = arith.constant 0 : index
    %c24 = arith.constant 24 : index
    %134 = vector.load %arg17[%c0_49, %c24] : memref<8x32xbf16, #tpu.memory_space<vmem>>, vector<8x8xbf16>
    tpu.vector_store %arg17[%c0_49, %c24], %133 {strides = array<i32>} : memref<8x32xbf16, #tpu.memory_space<vmem>>, vector<8x8xbf16>,
    %c0_50 = arith.constant 0 : index
    %c0_51 = arith.constant 0 : index
    %135 = vector.load %arg17[%c0_50, %c0_51] : memref<8x32xbf16, #tpu.memory_space<vmem>>, vector<8x32xbf16>
    %c0_52 = arith.constant 0 : index
    %c0_53 = arith.constant 0 : index
    %c0_54 = arith.constant 0 : index
    %136 = vector.load %arg6[%c0_52, %c0_53, %c0_54] : memref<1x32x32xbf16, #tpu.memory_space<vmem>>, vector<1x32x32xbf16>
    %137 = vector.shape_cast %136 : vector<1x32x32xbf16> to vector<32x32xbf16>
    %cst_55 = arith.constant dense<0.000000e+00> : vector<8x32xf32>
    %138 = tpu.matmul %135, %137, %cst_55 {dimension_numbers = #tpu.dot_dimension_numbers<[1], [0], [0], [1], [0, 0, 1, 1], [], []>} : vector<8x32xbf16>, vector<32x32xbf16>, vector<8x32xf32> -> vector<8x32xf32>
    %c0_56 = arith.constant 0 : index
    %c0_57 = arith.constant 0 : index
    %c0_58 = arith.constant 0 : index
    %139 = vector.load %arg7[%c0_56, %c0_57, %c0_58] : memref<1x1x32xf32, #tpu.memory_space<vmem>>, vector<1x1x32xf32>
    %140 = vector.shape_cast %139 : vector<1x1x32xf32> to vector<1x32xf32>
    %141 = vector.broadcast %140 : vector<1x32xf32> to vector<8x32xf32>
    %142 = arith.addf %138, %141 : vector<8x32xf32>
    %143 = arith.addf %4, %142 : vector<8x32xf32>
    %c0_59 = arith.constant 0 : index
    %c0_60 = arith.constant 0 : index
    %c0_61 = arith.constant 0 : index
    %144 = vector.load %arg10[%c0_59, %c0_60, %c0_61] : memref<1x1x32xf32, #tpu.memory_space<vmem>>, vector<1x1x32xf32>
    %145 = vector.shape_cast %144 : vector<1x1x32xf32> to vector<1x32xf32>
    %c0_62 = arith.constant 0 : index
    %c0_63 = arith.constant 0 : index
    %c0_64 = arith.constant 0 : index
    %146 = vector.load %arg11[%c0_62, %c0_63, %c0_64] : memref<1x1x32xf32, #tpu.memory_space<vmem>>, vector<1x1x32xf32>
    %147 = vector.shape_cast %146 : vector<1x1x32xf32> to vector<1x32xf32>
    %cst_65 = arith.constant dense<0.000000e+00> : vector<8xf32>
    %148 = vector.multi_reduction <add>, %143, %cst_65 [1] : vector<8x32xf32> to vector<8xf32>
    %149 = vector.shape_cast %148 : vector<8xf32> to vector<8x1xf32>
    %cst_66 = arith.constant 3.200000e+01 : f32
    %150 = vector.broadcast %cst_66 : f32 to vector<8x1xf32>
    %151 = arith.divf %149, %150 : vector<8x1xf32>
    %152 = vector.broadcast %151 : vector<8x1xf32> to vector<8x32xf32>
    %153 = arith.subf %143, %152 : vector<8x32xf32>
    %154 = arith.mulf %153, %153 : vector<8x32xf32>
    %cst_67 = arith.constant dense<0.000000e+00> : vector<8xf32>
    %155 = vector.multi_reduction <add>, %154, %cst_67 [1] : vector<8x32xf32> to vector<8xf32>
    %156 = vector.shape_cast %155 : vector<8xf32> to vector<8x1xf32>
    %cst_68 = arith.constant 3.200000e+01 : f32
    %157 = vector.broadcast %cst_68 : f32 to vector<8x1xf32>
    %158 = arith.divf %156, %157 : vector<8x1xf32>
    %159 = vector.broadcast %151 : vector<8x1xf32> to vector<8x32xf32>
    %160 = arith.subf %143, %159 : vector<8x32xf32>
    %cst_69 = arith.constant 9.99999974E-6 : f32
    %161 = vector.broadcast %cst_69 : f32 to vector<8x1xf32>
    %162 = arith.addf %158, %161 : vector<8x1xf32>
    %163 = math.rsqrt %162 : vector<8x1xf32>
    %164 = vector.broadcast %163 : vector<8x1xf32> to vector<8x32xf32>
    %165 = arith.mulf %160, %164 : vector<8x32xf32>
    %166 = vector.broadcast %145 : vector<1x32xf32> to vector<8x32xf32>
    %167 = arith.mulf %165, %166 : vector<8x32xf32>
    %168 = vector.broadcast %147 : vector<1x32xf32> to vector<8x32xf32>
    %169 = arith.addf %167, %168 : vector<8x32xf32>
    %170 = arith.truncf %169 : vector<8x32xf32> to vector<8x32xbf16>
    %c0_70 = arith.constant 0 : index
    %c0_71 = arith.constant 0 : index
    %c0_72 = arith.constant 0 : index
    %171 = vector.load %arg12[%c0_70, %c0_71, %c0_72] : memref<1x32x128xbf16, #tpu.memory_space<vmem>>, vector<1x32x128xbf16>
    %172 = vector.shape_cast %171 : vector<1x32x128xbf16> to vector<32x128xbf16>
    %cst_73 = arith.constant dense<0.000000e+00> : vector<8x128xf32>
    %173 = tpu.matmul %170, %172, %cst_73 {dimension_numbers = #tpu.dot_dimension_numbers<[1], [0], [0], [1], [0, 0, 1, 1], [], []>} : vector<8x32xbf16>, vector<32x128xbf16>, vector<8x128xf32> -> vector<8x128xf32>
    %c0_74 = arith.constant 0 : index
    %c0_75 = arith.constant 0 : index
    %c0_76 = arith.constant 0 : index
    %174 = vector.load %arg13[%c0_74, %c0_75, %c0_76] : memref<1x1x128xf32, #tpu.memory_space<vmem>>, vector<1x1x128xf32>
    %175 = vector.shape_cast %174 : vector<1x1x128xf32> to vector<1x128xf32>
    %176 = vector.broadcast %175 : vector<1x128xf32> to vector<8x128xf32>
    %177 = arith.addf %173, %176 : vector<8x128xf32>
    %cst_77 = arith.constant 0.000000e+00 : f32
    %178 = vector.broadcast %cst_77 : f32 to vector<8x128xf32>
    %179 = arith.maximumf %177, %178 : vector<8x128xf32>
    %180 = arith.truncf %179 : vector<8x128xf32> to vector<8x128xbf16>
    %c0_78 = arith.constant 0 : index
    %c0_79 = arith.constant 0 : index
    %c0_80 = arith.constant 0 : index
    %181 = vector.load %arg14[%c0_78, %c0_79, %c0_80] : memref<1x128x32xbf16, #tpu.memory_space<vmem>>, vector<1x128x32xbf16>
    %182 = vector.shape_cast %181 : vector<1x128x32xbf16> to vector<128x32xbf16>
    %cst_81 = arith.constant dense<0.000000e+00> : vector<8x32xf32>
    %183 = tpu.matmul %180, %182, %cst_81 {dimension_numbers = #tpu.dot_dimension_numbers<[1], [0], [0], [1], [0, 0, 1, 1], [], []>} : vector<8x128xbf16>, vector<128x32xbf16>, vector<8x32xf32> -> vector<8x32xf32>
    %c0_82 = arith.constant 0 : index
    %c0_83 = arith.constant 0 : index
    %c0_84 = arith.constant 0 : index
    %184 = vector.load %arg15[%c0_82, %c0_83, %c0_84] : memref<1x1x32xf32, #tpu.memory_space<vmem>>, vector<1x1x32xf32>
    %185 = vector.shape_cast %184 : vector<1x1x32xf32> to vector<1x32xf32>
    %186 = vector.broadcast %185 : vector<1x32xf32> to vector<8x32xf32>
    %187 = arith.addf %183, %186 : vector<8x32xf32>
    %188 = arith.addf %143, %187 : vector<8x32xf32>
    %189 = vector.shape_cast %188 : vector<8x32xf32> to vector<1x8x32xf32>
    %c0_85 = arith.constant 0 : index
    %c0_86 = arith.constant 0 : index
    %c0_87 = arith.constant 0 : index
    %190 = vector.load %arg16[%c0_85, %c0_86, %c0_87] : memref<1x8x32xf32, #tpu.memory_space<vmem>>, vector<1x8x32xf32>
    tpu.vector_store %arg16[%c0_85, %c0_86, %c0_87], %189 {strides = array<i32>} : memref<1x8x32xf32, #tpu.memory_space<vmem>>, vector<1x8x32xf32>,
    return
  }
  func.func @transform_0(%arg0: i32, %arg1: i32) -> (i32, i32, i32) {
    %c0_i32 = arith.constant 0 : i32
    %c0_i32_0 = arith.constant 0 : i32
    %c0_i32_1 = arith.constant 0 : i32
    return %arg0, %c0_i32, %c0_i32_0 : i32, i32, i32
  }
  func.func @transform_1(%arg0: i32, %arg1: i32) -> (i32, i32, i32) {
    %c0_i32 = arith.constant 0 : i32
    %c0_i32_0 = arith.constant 0 : i32
    %c0_i32_1 = arith.constant 0 : i32
    return %arg1, %c0_i32, %c0_i32_0 : i32, i32, i32
  }
  func.func @transform_2(%arg0: i32, %arg1: i32) -> (i32, i32, i32) {
    %c0_i32 = arith.constant 0 : i32
    %c0_i32_0 = arith.constant 0 : i32
    %c0_i32_1 = arith.constant 0 : i32
    return %arg1, %c0_i32, %c0_i32_0 : i32, i32, i32
  }
  func.func @transform_3(%arg0: i32, %arg1: i32) -> (i32, i32, i32) {
    %c0_i32 = arith.constant 0 : i32
    %c0_i32_0 = arith.constant 0 : i32
    %c0_i32_1 = arith.constant 0 : i32
    return %arg1, %c0_i32, %c0_i32_0 : i32, i32, i32
  }
  func.func @transform_4(%arg0: i32, %arg1: i32) -> (i32, i32, i32) {
    %c0_i32 = arith.constant 0 : i32
    %c0_i32_0 = arith.constant 0 : i32
    %c0_i32_1 = arith.constant 0 : i32
    return %arg1, %c0_i32, %c0_i32_0 : i32, i32, i32
  }
  func.func @transform_5(%arg0: i32, %arg1: i32) -> (i32, i32, i32) {
    %c0_i32 = arith.constant 0 : i32
    %c0_i32_0 = arith.constant 0 : i32
    %c0_i32_1 = arith.constant 0 : i32
    return %arg1, %c0_i32, %c0_i32_0 : i32, i32, i32
  }
  func.func @transform_6(%arg0: i32, %arg1: i32) -> (i32, i32, i32) {
    %c0_i32 = arith.constant 0 : i32
    %c0_i32_0 = arith.constant 0 : i32
    %c0_i32_1 = arith.constant 0 : i32
    return %arg1, %c0_i32, %c0_i32_0 : i32, i32, i32
  }
  func.func @transform_7(%arg0: i32, %arg1: i32) -> (i32, i32, i32) {
    %c0_i32 = arith.constant 0 : i32
    %c0_i32_0 = arith.constant 0 : i32
    %c0_i32_1 = arith.constant 0 : i32
    return %arg1, %c0_i32, %c0_i32_0 : i32, i32, i32
  }
  func.func @transform_8(%arg0: i32, %arg1: i32) -> (i32, i32, i32) {
    %c0_i32 = arith.constant 0 : i32
    %c0_i32_0 = arith.constant 0 : i32
    %c0_i32_1 = arith.constant 0 : i32
    return %arg1, %c0_i32, %c0_i32_0 : i32, i32, i32
  }
  func.func @transform_9(%arg0: i32, %arg1: i32) -> (i32, i32, i32) {
    %c0_i32 = arith.constant 0 : i32
    %c0_i32_0 = arith.constant 0 : i32
    %c0_i32_1 = arith.constant 0 : i32
    return %arg1, %c0_i32, %c0_i32_0 : i32, i32, i32
  }
  func.func @transform_10(%arg0: i32, %arg1: i32) -> (i32, i32, i32) {
    %c0_i32 = arith.constant 0 : i32
    %c0_i32_0 = arith.constant 0 : i32
    %c0_i32_1 = arith.constant 0 : i32
    return %arg1, %c0_i32, %c0_i32_0 : i32, i32, i32
  }
  func.func @transform_11(%arg0: i32, %arg1: i32) -> (i32, i32, i32) {
    %c0_i32 = arith.constant 0 : i32
    %c0_i32_0 = arith.constant 0 : i32
    %c0_i32_1 = arith.constant 0 : i32
    return %arg1, %c0_i32, %c0_i32_0 : i32, i32, i32
  }
  func.func @transform_12(%arg0: i32, %arg1: i32) -> (i32, i32, i32) {
    %c0_i32 = arith.constant 0 : i32
    %c0_i32_0 = arith.constant 0 : i32
    %c0_i32_1 = arith.constant 0 : i32
    return %arg1, %c0_i32, %c0_i32_0 : i32, i32, i32
  }
  func.func @transform_13(%arg0: i32, %arg1: i32) -> (i32, i32, i32) {
    %c0_i32 = arith.constant 0 : i32
    %c0_i32_0 = arith.constant 0 : i32
    %c0_i32_1 = arith.constant 0 : i32
    return %arg1, %c0_i32, %c0_i32_0 : i32, i32, i32
  }
  func.func @transform_14(%arg0: i32, %arg1: i32) -> (i32, i32, i32) {
    %c0_i32 = arith.constant 0 : i32
    %c0_i32_0 = arith.constant 0 : i32
    %c0_i32_1 = arith.constant 0 : i32
    return %arg0, %c0_i32, %c0_i32_0 : i32, i32, i32
  }
}

</mosaic_0001>

<bundles_post_ra>
// kernel: tpu_custom_call.1
= control target key start
LH: loop header
LB: loop body
LE: loop exit
PB: predicated region body
PF: predicated region fallthrough
CT: control target
= control target key end

     0   :  { %s2597_s0 = inlined_call_operand.hbm [shape: f32[2,8,32], index: 0, kind: input, shape index: {}]   ;;  %s2598_s1 = inlined_call_operand.vmem [shape: bf16[2,32,32], index: 1, kind: input, shape index: {}]   ;;  %s2599_s2 = inlined_call_operand.vmem [shape: bf16[2,32,32], index: 2, kind: input, shape index: {}]   ;;  %s2600_s3 = inlined_call_operand.vmem [shape: bf16[2,32,32], index: 3, kind: input, shape index: {}]   ;;  %s2601_s4 = inlined_call_operand.vmem [shape: bf16[2,32,32], index: 4, kind: input, shape index: {}]   ;;  %s2602_s5 = inlined_call_operand.vmem [shape: f32[2,1,32], index: 5, kind: input, shape index: {}]   ;;  %s2603_s6 = inlined_call_operand.vmem [shape: f32[2,1,32], index: 6, kind: input, shape index: {}]   ;;  %s2604_s7 = inlined_call_operand.hbm [shape: f32[2,1,32], index: 7, kind: input, shape index: {}]   ;;  %s2605_s8 = inlined_call_operand.vmem [shape: f32[2,1,32], index: 8, kind: input, shape index: {}]   ;;  %s2606_s9 = inlined_call_operand.hbm [shape: f32[2,1,32], index: 9, kind: input, shape index: {}]   ;;  %s2607_s10 = inlined_call_operand.vmem [shape: bf16[2,32,128], index: 10, kind: input, shape index: {}]   ;;  %s2608_s11 = inlined_call_operand.vmem [shape: f32[2,1,128], index: 11, kind: input, shape index: {}]   ;;  %s2609_s12 = inlined_call_operand.vmem [shape: bf16[2,128,32], index: 12, kind: input, shape index: {}]   ;;  %s2610_s13 = inlined_call_operand.vmem [shape: f32[2,1,32], index: 13, kind: input, shape index: {}]   ;;  %s2611_s14 = inlined_call_operand.hbm [shape: f32[2,8,32], index: 14, kind: output, shape index: {}]  }
   0x1   :  { %2631 = sst [smem:[#allocation30_spill]] %s2597_s0 }
   0x2   :  { %2632 = sst [smem:[#allocation31_spill]] %s2598_s1 }
   0x3   :  { %2633 = sst [smem:[#allocation32_spill]] %s2599_s2 }
   0x4   :  { %2634 = sst [smem:[#allocation33_spill]] %s2600_s3 }
   0x5   :  { %2635 = sst [smem:[#allocation34_spill]] %s2601_s4 }
   0x6   :  { %2636 = sst [smem:[#allocation35_spill]] %s2602_s5 }
   0x7   :  { %2637 = sst [smem:[#allocation36_spill]] %s2603_s6 }
   0x8   :  { %2638 = sst [smem:[#allocation37_spill]] %s2604_s7 }
   0x9   :  { %2639 = sst [smem:[#allocation38_spill]] %s2605_s8 }
   0xa   :  { %2640 = sst [smem:[#allocation39_spill]] %s2606_s9 }
   0xb   :  { %2641 = sst [smem:[#allocation40_spill]] %s2607_s10 }
   0xc   :  { %2642 = sst [smem:[#allocation41_spill]] %s2608_s11 }
   0xd   :  { %2643 = sst [smem:[#allocation42_spill]] %s2609_s12 }
   0xe   :  { %2644 = sst [smem:[#allocation43_spill]] %s2610_s13 }
   0xf   :  { %2645 = sst [smem:[#allocation44_spill]] %s2611_s14 }
  0x10   :  { %19 = vsyncpa [#allocation4], 0 }
  0x11   :  { %21 = vsyncpa [#allocation4 + $0x1], 0 }
  0x12   :  { %22 = vsyncpa [#allocation7], 0 }
  0x13   :  { %24 = vsyncpa [#allocation7 + $0x1], 0 }
  0x14   :  { %25 = vsyncpa [#allocation5], 0 }
  0x15   :  { %27 = vsyncpa [#allocation5 + $0x1], 0  ;;  %s2183_s29 = smov 0   ;;  %s2185_s30 = smov 0  }
  0x16   :  { %s2187_s15 = smov 0   ;;  %s2189_s16 = smov 0  }
  0x17   :  { %s2191_s17 = smov 0   ;;  %s2193_s18 = smov 0  }
  0x18   :  { %s2195_s19 = smov 0   ;;  %s2197_s20 = smov 0  }
  0x19   :  { %s2199_s21 = smov 0   ;;  %s2201_s22 = smov 0  }
  0x1a   :  { %s2203_s23 = smov 0  }
  0x1b LB: > { %2646 = sst [smem:[#allocation13_spill]] %s2063_s30  ;;  %s2237_s24 = sadd.s32 4294967295, %s2099_s23   ;;  %s2099_s23 = sphi %s2203_s23, %s33_s23   ;;  %s2095_s22 = sphi %s2201_s22, %s2711_s22   ;;  %s2091_s21 = sphi %s2199_s21, %s2710_s21   ;;  %s2087_s20 = sphi %s2197_s20, %s2709_s20   ;;  %s2083_s19 = sphi %s2195_s19, %s2708_s19   ;;  %s2079_s18 = sphi %s2193_s18, %s2707_s18   ;;  %s2075_s17 = sphi %s2191_s17, %s2706_s17   ;;  %s2071_s16 = sphi %s2189_s16, %s2705_s16   ;;  %s2067_s15 = sphi %s2187_s15, %s2704_s15   ;;  %s2063_s30 = sphi %s2185_s30, %s2703_s30   ;;  %s2059_s29 = sphi %s2183_s29, %s2702_s29  }
  0x1c   : > { %2647 = sst [smem:[#allocation14_spill]] %s2067_s15  ;;  %s42_s25 = sadd.s32 1, %s2091_s21 }
  0x1d   : > { %2648 = sst [smem:[#allocation15_spill]] %s2071_s16  ;;  %p2240_p0 = scmp.ge.s32.totalorder %s42_s25, 2 }
  0x1e   : > { %2649 = sst [smem:[#allocation16_spill]] %s2075_s17  ;;  %p60_p1 = scmp.eq.s32.totalorder %s2099_s23, 0 }
  0x1f   : > { %2650 = sst [smem:[#allocation17_spill]] %s2079_s18  ;;  %p66_p2 = scmp.eq.s32.totalorder %s2237_s24, 0 }
  0x20   : > { %2651 = sst [smem:[#allocation18_spill]] %s2087_s20  ;;  %s234_s27 = sadd.s32 1, %s2067_s15 }
  0x21   : > { %2652 = sst [smem:[#allocation19_spill]] %s2091_s21  ;;  %s2713_s25 = smov (%p2240_p0, %s42_s25), 0 }
  0x22   : > { %2653 = sst [smem:[#allocation20_spill]] %s2095_s22  ;;  %p241_p3 = scmp.ne.s32.totalorder %s2067_s15, %s2063_s30 }
  0x23   : > { %2654 = sst [smem:[#allocation21_spill]] %s2099_s23  ;;  %p247_p4 = scmp.ne.s32.totalorder %s2063_s30, %s2059_s29 }
  0x24   : > { %2656 = sst [smem:[#allocation22_spill]] %s2713_s25  ;;  %s231_s28 = ssub.s32 %s2091_s21, %s2713_s25 }
  0x25   : > { %p232_p5 = scmp.eq.s32.totalorder %s231_s28, 0  ;;  %p243_p6 = por %p241_p3, %p60_p1 }
  0x26   : > { %p2260_p7 = por %p247_p4, %p66_p2  ;;  %p2615_p8 = scmp.lt.s32.totalorder %s2099_s23, 4 }
  0x27   : > { %s2266_s20 = scalar_select %p232_p5, %s2067_s15, %s234_s27  }
  0x28   : > { %s516_s12 = sand.u32 1, %s2099_s23   ;;  %s2614_s13 = sand.u32 1, %s2067_s15  }
  0x29   : > { %2658 = sst [smem:[#allocation23_spill]] %s2266_s20  ;;  %s519_s25 = scalar_lea.vmem [#allocation6], %s2614_s13 }
  0x2a   : > { %s2659_s7 = sld [smem:[#allocation37_spill]]  ;;  %s526_s10 = sshll.u32 %s519_s25, 4  ;;  %s527_s10 = int_to_ptr.vmem [resolvable:$true] %s526_s10 }
  0x2b   : > { %p2278_p9 = pnand %p2615_p8, %p243_p6  ;;  %p1606_p10 = scmp.ge.s32.totalorder %s2099_s23, 1 }
  0x2c   : > { %p582_p11 = scmp.lt.s32.totalorder %s2099_s23, 5  ;;  %s2284_s11 = scalar_lea.sflag [#allocation7], %s516_s12 }
  0x2d   : > { %s1601_s29 = sadd.s32 4294967294, %s2099_s23   ;;  %s52_s13 = sadd.s32 1, %s2079_s18 }
  0x2e   : > { %p2289_p12 = pnand %p1606_p10, %p582_p11  ;;  %p59_p13 = scmp.ne.s32.totalorder %s2079_s18, %s2075_s17 }
  0x2f   : > { %p65_p3 = scmp.ne.s32.totalorder %s2075_s17, %s2071_s16  ;;  %p427_p5 = scmp.eq.s32.totalorder %s2237_s24, 3 }
  0x30   : > { %s522_s28 = scalar_lea.hbm %s2659_s7, %s2091_s21  ;;  %p2306_p6 = por %p60_p1, %p59_p13 }
  0x31   : > { %s524_s8 = sshll.u32 %s522_s28, 4  ;;  %s45_s28 = sadd.s32 1, %s2095_s22  ;;  %s525_s8 = int_to_ptr.hbm [resolvable:$true] %s524_s8 }
  0x32   : > { %1749 = dma.hbm_to_vmem [thread:$0]  (!%p2278_p9), %s525_s8, 16, %s527_s10, %s2284_s11  }
  0x33   : > { %s2715_s28 = smov (!%p2240_p0, %s45_s28), %s2095_s22  ;;  %p2312_p10 = por %p66_p2, %p65_p3 }
  0x34   : > { %p47_p4 = scmp.ge.s32.totalorder %s2715_s28, 2  ;;  %p2318_p0 = por %p427_p5, %p59_p13 }
  0x35   : > { %p433_p11 = scmp.eq.s32.totalorder %s1601_s29, 3  ;;  %s453_s7 = sand.u32 1, %s2079_s18  }
  0x36   : > { %s2717_s28 = smov (%p47_p4, %s2715_s28), 0  ;;  %s1604_s16 = sshll.u32 %s453_s7, 3 }
  0x37   : > { %2664 = sst [smem:[#allocation24_spill]] %s2717_s28  ;;  %s49_s26 = ssub.s32 %s2095_s22, %s2717_s28 }
  0x38   : > { %s2665_s10 = scalar_select %p2318_p0, 1, 0 }
  0x39   : > { %p50_p1 = scmp.eq.s32.totalorder %s49_s26, 0  ;;  %p2325_p8 = por %p433_p11, %p65_p3 }
  0x3a   : > { %2666 = sst [smem:[#allocation25_spill]] %s2665_s10  ;;  %s1605_s4 = sshll.u32 %s2095_s22, 3 }
  0x3b   : > { %s2667_s20 = scalar_select %p2325_p8, 1, 0 }
  0x3c   : > { %s2330_s6 = scalar_select %p50_p1, %s2079_s18, %s52_s13  }
  0x3d   : > { %2668 = sst [smem:[#allocation26_spill]] %s2667_s20  ;;  %s457_s1 = scalar_lea.vmem [#allocation3], %s1604_s16 }
  0x3e   : > { %2669 = sst [smem:[#allocation27_spill]] %s2330_s6  ;;  %s465_s29 = sshll.u32 %s457_s1, 4  ;;  %s466_s29 = int_to_ptr.vmem [resolvable:$true] %s465_s29 }
  0x3f   : > { %s2670_s0 = sld [smem:[#allocation30_spill]]  ;;  %p2671_p2 = scmp.lt.s32.totalorder %s2099_s23, 4 }
  0x40   : > { %s2672_s9 = sld [smem:[#allocation39_spill]]  ;;  %s2673_s6 = sand.u32 1, %s2067_s15  }
  0x41   : > { %p1744_p13 = pnand %p2671_p2, %p2306_p6  ;;  %s542_s22 = scalar_lea.vmem [#allocation8], %s2673_s6 }
  0x42   : > { %s549_s18 = sshll.u32 %s542_s22, 4  ;;  %s454_s2 = scalar_lea.sflag [#allocation4], %s453_s7  ;;  %s550_s18 = int_to_ptr.vmem [resolvable:$true] %s549_s18 }
  0x45   : > { %s461_s10 = scalar_lea.hbm %s2670_s0, %s1605_s4  ;;  %586 = sbr.rel (%p2289_p12) target bundleno = 1984 (0x7c0), region = 76 }
  0x46   : > { %s463_s5 = sshll.u32 %s461_s10, 4  ;;  %s545_s13 = scalar_lea.hbm %s2672_s9, %s2091_s21  ;;  %s464_s5 = int_to_ptr.hbm [resolvable:$true] %s463_s5 }
  0x47   : > { %s547_s20 = sshll.u32 %s545_s13, 4  ;;  %s548_s20 = int_to_ptr.hbm [resolvable:$true] %s547_s20 }
  0x48   : > { %1746 = dma.hbm_to_vmem [thread:$0]  (!%p1744_p13), %s464_s5, 128, %s466_s29, %s454_s2  }
  0x49   : > { %1752 = dma.hbm_to_vmem [thread:$0]  (!%p2278_p9), %s548_s20, 16, %s550_s18, %s2284_s11  }
  0x4a   : > { %s2352_s1 = sand.u32 1, %s2075_s17  }
  0x4b   : > { %2674 = sst [smem:[#allocation28_spill]] %s2352_s1  ;;  %s1607_s3 = sshll.u32 %s2352_s1, 3 }
  0x4c   : > { %s589_s4 = scalar_lea.sflag [#allocation4], %s2352_s1  ;;  %s592_s6 = scalar_lea.vmem [#allocation3], %s1607_s3 }
  0x4d   : > { %2046 = dma.done.wait (%p2312_p10), %s589_s4, 128  }
  0x4e   : > { %2048 = vsyncadd (%p2312_p10), %s589_s4, 4294967168  ;;  %s598_s5 = sand.u32 1, %s2237_s24   ;;  %s600_s7 = sand.u32 1, %s2063_s30  }
  0x4f   : > { %s599_s16 = scalar_lea.sflag [#allocation7], %s598_s5  ;;  %s2362_s18 = scalar_lea.vmem [#allocation6], %s600_s7 }
  0x50   : > { %2050 = dma.done.wait (%p2260_p7), %s599_s16, 32  }
  0x51   : > { %2052 = vsyncadd (%p2260_p7), %s599_s16, 4294967264  ;;  %p709_p9 = scmp.lt.s32.totalorder %s2083_s19, 1  ;;  %s2676_s12 = sld [smem:[#allocation31_spill]] }
  0x52   : > { %s2677_s26 = sld [smem:[#allocation32_spill]]  ;;  %s2426_s25 = scalar_lea.vmem [#allocation9], %s1607_s3 }
  0x53   : > { %s2370_s20 = scalar_select %p709_p9, %s2083_s19, 1 }
  0x54   : > { %s2678_s5 = sld [smem:[#allocation33_spill]]  ;;  %p1621_p7 = scmp.ne.s32.totalorder %s2083_s19, 0 }
  0x55   : > { %s1711_s22 = sshll.u32 %s2370_s20, 4  ;;  %s2679_s21 = sld [smem:[#allocation34_spill]] }
  0x56   : > { %s2682_s17 = sld [smem:[#allocation38_spill]]  ;;  %s1716_s0 = sshll.u32 %s2370_s20, 6 }
  0x57   : > { %s2380_s8 = scalar_lea.vmem %s2676_s12, %s1711_s22  ;;  %s2683_s15 = sld [smem:[#allocation40_spill]] }
  0x58   : > { %s2385_s13 = scalar_lea.vmem %s2677_s26, %s1711_s22  ;;  %s2685_s1 = sld [smem:[#allocation43_spill]] }
  0x59   : > { %s2686_s28 = sld [smem:[#allocation42_spill]] }
  0x5a   : > { %s2390_s16 = scalar_lea.vmem %s2678_s5, %s1711_s22  ;;  %s2684_s5 = sld [smem:[#allocation41_spill]] }
  0x5b   : > { %s2395_s24 = scalar_lea.vmem %s2679_s21, %s1711_s22 }
  0x5c   : > { %2680 = sst [smem:[#allocation29_spill]] %s2395_s24  ;;  %s737_s10 = scalar_lea.vmem %s2682_s17, %s2370_s20 }
  0x5d   : > { %s2408_s30 = scalar_lea.vmem %s2683_s15, %s1711_s22  ;;  %s2424_s17 = scalar_lea.vmem [#allocation8], %s600_s7 }
  0x5e   : > { %s753_s24 = scalar_lea.vmem %s2685_s1, %s2370_s20  ;;  %758 = sbr.rel (%p1621_p7) target bundleno = 101 (0x65), region = 92 }
  0x5f   : > { %s2422_s14 = scalar_lea.vmem %s2686_s28, %s1716_s0 }
  0x60   : > { %s745_s23 = scalar_lea.vmem %s2684_s5, %s2370_s20 }
  0x63   : > { %v759_v0 = vld [vmem:[%s592_s6] sm:$0xff]  ;;  %vm760_vm0 = vcmask 261120  }
  0x64   : > { %761 = vst.msk [vmem:[%s2426_s25] sm:$0xff] %vm760_vm0, %v759_v0 }
  0x65 PF: > { %vm765_vm1 = vcmask 261120   ;;  %v2101_v3 = vmov 32.0   ;;  %v1718_v15 = vld [vmem:[%s2380_s8 + $0x8] sm:$0xff]  ;;  %v1717_v17 = vld [vmem:[%s2380_s8] sm:$0xff]  ;;  %s2687_s1 = sld [smem:[#allocation36_spill]]  ;;  %vm902_vm6 = vcmask 64512   ;;  %v897_v60 = vlaneseq }
  0x66   : > { %1861 = vrcp.f32 %v2101_v3  ;;  %v1720_v16 = vld [vmem:[%s2385_s13 + $0x8] sm:$0xff]  ;;  %829 = vmatpush.bf16.msra.mxu0 %v1718_v15  ;;  %v1719_v18 = vld [vmem:[%s2385_s13] sm:$0xff]  ;;  %s2102_s6 = smov 112   ;;  %s2103_s7 = smov 120   ;;  %vm938_vm7 = vcmask 1043456   ;;  %vm956_vm9 = vcmask 60416  }
  0x67   : > { %859 = vmatpush.bf16.msra.mxu2 %v1720_v16  ;;  %v1722_v19 = vld [vmem:[%s2390_s16 + $0x8] sm:$0xff]  ;;  %v1721_v22 = vld [vmem:[%s2390_s16] sm:$0xff]  ;;  %v898_v61 = vshrl.u32 %v897_v60, 7  ;;  %v900_v62 = vand.u32 127, %v897_v60  ;;  %s2105_s22 = smov 8   ;;  %s2689_s8 = sld [smem:[#allocation29_spill]] }
  0x68   : > { %v1855_v33 = vld [vmem:[%s2362_s18] ss:$0 sm:$0xff]  ;;  %s2104_s18 = smov 104   ;;  %s2106_s13 = smov 16   ;;  %vm1029_vm10 = vcmask 126016   ;;  %vm1093_vm11 = vcmask 191616  }
  0x69   : > { %vm901_vm8 = vcmp.le.s32.totalorder %v900_v62, %v898_v61  ;;  %s2107_s16 = smov 24   ;;  %vm1157_vm12 = vcmask 257216   ;;  %s2690_s26 = sld [smem:[#allocation35_spill]] }
  0x6a   : > { %830 = vmatpush.bf16.msra.mxu0 %v1717_v17  ;;  %s2693_s0 = sld [smem:[#allocation18_spill]] }
  0x6b   : > { %v2431_v1 = vld [vmem:[%s2426_s25] sm:$0xff]  ;;  %860 = vmatpush.bf16.msra.mxu2 %v1719_v18  ;;  %s2688_s3 = scalar_lea.vmem %s2687_s1, %s2370_s20  ;;  %s2695_s27 = sld [smem:[#allocation28_spill]] }
  0x6c   : > { %v766_v2 = vsel %vm765_vm1, %v2431_v1, 0.0  ;;  %v1862_v4 = vpop.eup %1861  ;;  %v1854_v30 = vld [vmem:[%s2688_s3] ss:$0 sm:$0xff]  ;;  %s2698_s3 = sld [smem:[#allocation44_spill]] }
  0x6d   : > { %767 = vadd.xlane.f32.xlu0 %v766_v2  ;;  %v770_v5 = vmul.f32 32.0, %v1862_v4  ;;  %vm774_vm2 = vweird.f32 %v1862_v4 }
  0x6f   : > { %v771_v6 = vsub.f32 1.0, %v770_v5  ;;  %889 = vmatpush.bf16.msrb.mxu2 %v1722_v19  ;;  %s2691_s2 = scalar_lea.vmem %s2690_s26, %s2370_s20 }
  0x70   : > { %s1708_s11 = sshll.u32 %s2693_s0, 3 }
  0x71   : > { %v772_v7 = vmul.f32 %v1862_v4, %v771_v6 }
  0x73   : > { %v773_v8 = vadd.f32 %v1862_v4, %v772_v7  ;;  %890 = vmatpush.bf16.msrb.mxu2 %v1721_v22 }
  0x75   : > { %v2435_v9 = vsel %vm774_vm2, %v1862_v4, %v773_v8 }
  0xe0   : > { %v768_v10 = vpop.xlane.xlu0 %767 }
  0xe1   : > { %v776_v11 = vmul.f32 %v2435_v9, %v768_v10 }
  0xe3   : > { %v777_v12 = vsub.f32 %v2431_v1, %v776_v11 }
  0xe5   : > { %v778_v13 = vmul.f32 %v777_v12, %v777_v12 }
  0xe7   : > { %v779_v14 = vsel %vm765_vm1, %v778_v13, 0.0 }
  0xe8   : > { %780 = vadd.xlane.f32.xlu0 %v779_v14 }
 0x15b   : > { %v781_v20 = vpop.xlane.xlu0 %780 }
 0x15c   : > { %v782_v21 = vmul.f32 %v781_v20, %v2435_v9 }
 0x15e   : > { %v783_v23 = vadd.f32 1e-05, %v782_v21 }
 0x160   : > { %1863 = vrsqrt.f32 %v783_v23  ;;  %vm790_vm4 = vweird.f32 %v783_v23 }
 0x166   : > { %v1864_v24 = vpop.eup %1863 }
 0x167   : > { %v785_v25 = vmul.f32 %v1864_v24, %v783_v23  ;;  %vm791_vm3 = vweird.f32 %v1864_v24 }
 0x168   : > { %vm792_vm5 = vmor %vm790_vm4, %vm791_vm3 }
 0x169   : > { %v786_v26 = vmul.f32 %v1864_v24, %v785_v25 }
 0x16b   : > { %v787_v27 = vmul.f32 0.5, %v786_v26 }
 0x16d   : > { %v788_v28 = vsub.f32 1.5, %v787_v27 }
 0x16f   : > { %v789_v29 = vmul.f32 %v1864_v24, %v788_v28 }
 0x171   : > { %v793_v31 = vsel %vm792_vm5, %v1864_v24, %v789_v29 }
 0x172   : > { %v794_v32 = vmul.f32 %v793_v31, %v777_v12 }
 0x174   : > { %v798_v34 = vmul.f32 %v1854_v30, %v794_v32 }
 0x176   : > { %v802_v35 = vadd.f32 %v1855_v33, %v798_v34 }
 0x178   : > { %v803_v36 = vpack.c.bf16 %v802_v35, %v802_v35 }
 0x17a   : > { %1630 = vmatmul.msk.bf16.vlgmr.msra.gmra.mxu0 %vm765_vm1, %v803_v36  ;;  %1639 = vmatmul.msk.bf16.vlgmr.msra.gmra.mxu2 %vm765_vm1, %v803_v36 }
 0x18a   : > { %1648 = vmatmul.msk.bf16.vlgmr.msrb.gmra.mxu2 %vm765_vm1, %v803_v36 }
 0x1f7   : > { %v832_v37 = vpop.f32.mrf.mxu0 }
 0x1f8   : > { %v836_v38 = vpack.c.bf16 %v832_v37, %v832_v37 }
 0x1fa   : > { %v959_v39 = vunpack.c.l.b16 %v836_v38 }
 0x1fc   : > { %v960_v40 = vpack.c.b16 %v959_v39, %v959_v39 }
 0x1fd   : > { %v862_v41 = vpop.f32.mrf.mxu2 }
 0x1fe   : > { %v866_v42 = vpack.c.bf16 %v862_v41, %v862_v41  ;;  %1031 = vrot.lane.b32.xlu0 %v960_v40, %s2102_s6 }
 0x1ff   : > { %v834_v43 = vpop.f32.mrf.mxu0 }
 0x200   : > { %v964_v44 = vunpack.c.l.b16 %v866_v42  ;;  %v907_v45 = vsel %vm902_vm6, %v866_v42, 0 }
 0x201   : > { %916 = vmatpush.bf16.xpose.msra.mxu3 %v907_v45 }
 0x202   : > { %v965_v46 = vpack.c.b16 %v964_v44, %v964_v44 }
 0x204   : > { %1033 = vrot.lane.b32.xlu2 %v965_v46, %s2102_s6  ;;  %966 = vrot.lane.b32.xlu1 %v965_v46, %s2103_s7 }
 0x205   : > { %v864_v47 = vpop.f32.mrf.mxu2 }
 0x208   : > { %1649 = vmatmul.msk.bf16.vlgmr.msra.gmra.mxu3 %vm902_vm6, %v836_v38 }
 0x20c   : > { %1097 = vrot.lane.b32.xlu2 %v965_v46, %s2104_s18  ;;  %961 = vrot.lane.b32.xlu1 %v960_v40, %s2103_s7 }
 0x20d   : > { %v892_v48 = vpop.f32.mrf.mxu2 }
 0x20e   : > { %v2463_v49 = vpack.c.bf16 %v892_v48, %v892_v48 }
 0x210   : > { %v940_v50 = vsel %vm938_vm7, %v2463_v49, 0  ;;  %v1001_v42 = vunpack.c.l.b16 %v2463_v49 }
 0x211   : > { %949 = vmatpush.bf16.msrb.mxu0 %v940_v50 }
 0x212   : > { %v1002_v43 = vpack.c.b16 %v1001_v42, %v1001_v42 }
 0x214   : > { %1095 = vrot.lane.b32.xlu1 %v960_v40, %s2104_s18 }
 0x215   : > { %v894_v51 = vpop.f32.mrf.mxu2 }
 0x25e   : > { %v1034_v52 = vpop.permute.xlu2 %1033 }
 0x25f   : > { %v1039_v53 = vsel %vm902_vm6, %v1034_v52, 0 }
 0x260   : > { %1048 = vmatpush.bf16.xpose.msrb.mxu3 %v1039_v53 }
 0x266   : > { %v1098_v55 = vpop.permute.xlu2 %1097 }
 0x267   : > { %v1103_v58 = vsel %vm902_vm6, %v1098_v55, 0 }
 0x270   : > { %v1032_v54 = vpop.permute.xlu0 %1031 }
 0x271   : > { %1653 = vmatmul.msk.bf16.vlgmr.msrb.gmra.mxu3 %vm902_vm6, %v1032_v54 }
 0x276   : > { %v967_v56 = vpop.permute.xlu1 %966 }
 0x277   : > { %v972_v57 = vsel %vm902_vm6, %v967_v56, 0 }
 0x278   : > { %981 = vmatpush.bf16.xpose.msra.mxu1 %v972_v57 }
 0x27e   : > { %v962_v59 = vpop.permute.xlu1 %961 }
 0x27f   : > { %1651 = vmatmul.msk.bf16.vlgmr.msra.gmra.mxu1 %vm902_vm6, %v962_v59 }
 0x280   : > { %1112 = vmatpush.bf16.xpose.msrb.mxu1 %v1103_v58 }
 0x286   : > { %v1096_v3 = vpop.permute.xlu1 %1095 }
 0x28b   : > { %v918_v63 = vpop.f32.mrf.mxu3 }
 0x28c   : > { %v922_v0 = vsel %vm901_vm8, %v918_v63, -1e+30 }
 0x28d   : > { %v923_v2 = vsel %vm902_vm6, %v922_v0, -inf }
 0x28e   : > { %924 = vmax.xlane.f32.xlu1 %v923_v2 }
 0x28f   : > { %1655 = vmatmul.msk.bf16.vlgmr.msrb.gmra.mxu1 %vm902_vm6, %v1096_v3 }
 0x293   : > { %v920_v4 = vpop.f32.mrf.mxu3 }
 0x2f4   : > { %v1050_v5 = vpop.f32.mrf.mxu3 }
 0x2f5   : > { %v1054_v13 = vsel %vm901_vm8, %v1050_v5, -1e+30 }
 0x2f6   : > { %v1055_v16 = vsel %vm902_vm6, %v1054_v13, -inf }
 0x2fc   : > { %v983_v6 = vpop.f32.mrf.mxu1  ;;  %v1052_v7 = vpop.f32.mrf.mxu3 }
 0x2fd   : > { %v987_v8 = vsel %vm901_vm8, %v983_v6, -1e+30 }
 0x2fe   : > { %v988_v10 = vsel %vm902_vm6, %v987_v8, -inf }
 0x2ff   : > { %989 = vmax.xlane.f32.xlu2 %v988_v10 }
 0x301   : > { %v925_v11 = vpop.xlane.xlu1 %924 }
 0x302   : > { %v926_v12 = vsub.f32 %v922_v0, %v925_v11 }
 0x304   : > { %v927_v14 = vmul.f32 1.442695, %v926_v12  ;;  %v985_v15 = vpop.f32.mrf.mxu1 }
 0x305   : > { %v1723_v15 = vld [vmem:[%s2689_s8] sm:$0xff] }
 0x306   : > { %1865 = vpow2.f32 %v927_v14  ;;  %v1724_v14 = vld [vmem:[%s2689_s8 + $0x8] sm:$0xff] }
 0x307   : > { %1056 = vmax.xlane.f32.xlu2 %v1055_v16  ;;  %1189 = vmatpush.bf16.msra.mxu3 %v1724_v14 }
 0x30b   : > { %1190 = vmatpush.bf16.msra.mxu3 %v1723_v15 }
 0x30c   : > { %v1866_v17 = vpop.eup %1865  ;;  %v1114_v18 = vpop.f32.mrf.mxu1 }
 0x30d   : > { %v1118_v19 = vsel %vm901_vm8, %v1114_v18, -1e+30  ;;  %v929_v20 = vsel %vm902_vm6, %v1866_v17, 0.0  ;;  %v1856_v18 = vld [vmem:[%s2691_s2] ss:$0 sm:$0xff] }
 0x30e   : > { %930 = vadd.xlane.f32.xlu1 %v929_v20  ;;  %v1119_v21 = vsel %vm902_vm6, %v1118_v19, -inf }
 0x30f   : > { %1120 = vmax.xlane.f32.xlu0 %v1119_v21 }
 0x314   : > { %v1116_v22 = vpop.f32.mrf.mxu1 }
 0x372   : > { %v990_v23 = vpop.xlane.xlu2 %989 }
 0x373   : > { %v991_v24 = vsub.f32 %v987_v8, %v990_v23 }
 0x375   : > { %v992_v25 = vmul.f32 1.442695, %v991_v24 }
 0x377   : > { %1867 = vpow2.f32 %v992_v25 }
 0x37a   : > { %v1057_v26 = vpop.xlane.xlu2 %1056 }
 0x37b   : > { %v1058_v27 = vsub.f32 %v1054_v13, %v1057_v26 }
 0x37d   : > { %v1868_v28 = vpop.eup %1867  ;;  %v1059_v29 = vmul.f32 1.442695, %v1058_v27 }
 0x37e   : > { %v994_v30 = vsel %vm902_vm6, %v1868_v28, 0.0 }
 0x37f   : > { %1869 = vpow2.f32 %v1059_v29  ;;  %995 = vadd.xlane.f32.xlu2 %v994_v30  ;;  %v1726_v29 = vld [vmem:[%s2408_s30 + $0x8] sm:$0xff]  ;;  %v1734_v30 = vld [vmem:[%s2422_s14 + $0x38] sm:$0xff] }
 0x380   : > { %1336 = vmatpush.bf16.msra.mxu1 %v1734_v30 }
 0x381   : > { %v931_v31 = vpop.xlane.xlu1 %930 }
 0x382   : > { %1871 = vrcp.f32 %v931_v31  ;;  %v1121_v32 = vpop.xlane.xlu0 %1120 }
 0x383   : > { %v1122_v33 = vsub.f32 %v1118_v19, %v1121_v32 }
 0x385   : > { %v1870_v34 = vpop.eup %1869  ;;  %v1123_v35 = vmul.f32 1.442695, %v1122_v33  ;;  %v1733_v33 = vld [vmem:[%s2422_s14 + $0x30] sm:$0xff] }
 0x386   : > { %v1061_v36 = vsel %vm902_vm6, %v1870_v34, 0.0  ;;  %1337 = vmatpush.bf16.msra.mxu1 %v1733_v33 }
 0x387   : > { %1873 = vpow2.f32 %v1123_v35  ;;  %1062 = vadd.xlane.f32.xlu0 %v1061_v36  ;;  %v1732_v35 = vld [vmem:[%s2422_s14 + $0x28] sm:$0xff]  ;;  %v1731_v36 = vld [vmem:[%s2422_s14 + $0x20] sm:$0xff] }
 0x388   : > { %v1872_v37 = vpop.eup %1871 }
 0x389   : > { %v933_v38 = vmul.f32 %v1872_v37, %v1866_v17 }
 0x38a   : > { %1338 = vmatpush.bf16.msra.mxu1 %v1732_v35 }
 0x38b   : > { %v934_v39 = vpack.c.bf16 %v933_v38, %v933_v38 }
 0x38d   : > { %v1874_v40 = vpop.eup %1873  ;;  %1650 = vmatmul.msk.bf16.vlgmr.msrb.gmra.mxu0 %vm902_vm6, %v934_v39  ;;  %v1730_v39 = vld [vmem:[%s2422_s14 + $0x18] sm:$0xff] }
 0x38e   : > { %v1125_v41 = vsel %vm902_vm6, %v1874_v40, 0.0  ;;  %1339 = vmatpush.bf16.msra.mxu1 %v1731_v36 }
 0x38f   : > { %1126 = vadd.xlane.f32.xlu1 %v1125_v41 }
 0x392   : > { %1340 = vmatpush.bf16.msra.mxu1 %v1730_v39 }
 0x397   : > { %1003 = vrot.lane.b32.xlu2 %v1002_v43, %s2103_s7 }
 0x39b   : > { %1067 = vrot.lane.b32.xlu0 %v1002_v43, %s2102_s6  ;;  %s1362_s6 = scalar_lea.hbm %s2698_s3, %s1708_s11 }
 0x39c   : > { %s1366_s7 = sshll.u32 %s1362_s6, 4  ;;  %s1367_s7 = int_to_ptr.hbm [resolvable:$true] %s1366_s7 }
 0x3a8   : > { %1131 = vrot.lane.b32.xlu1 %v1002_v43, %s2104_s18  ;;  %s1352_s18 = scalar_lea.sflag [#allocation5], %s2695_s27 }
 0x3f2   : > { %v996_v44 = vpop.xlane.xlu2 %995 }
 0x3f3   : > { %1875 = vrcp.f32 %v996_v44  ;;  %v1857_v44 = vld [vmem:[%s737_s10] ss:$0 sm:$0xff] }
 0x3f9   : > { %v1876_v45 = vpop.eup %1875 }
 0x3fa   : > { %v998_v46 = vmul.f32 %v1876_v45, %v1868_v28  ;;  %v1004_v47 = vpop.permute.xlu2 %1003  ;;  %v1063_v51 = vpop.xlane.xlu0 %1062 }
 0x3fb   : > { %v1009_v48 = vsel %vm938_vm7, %v1004_v47, 0  ;;  %1877 = vrcp.f32 %v1063_v51  ;;  %v1858_v47 = vld [vmem:[%s2424_s17] ss:$0 sm:$0xff] }
 0x3fc   : > { %v999_v50 = vpack.c.bf16 %v998_v46, %v998_v46  ;;  %1018 = vmatpush.bf16.msra.mxu2 %v1009_v48 }
 0x3ff   : > { %1652 = vmatmul.msk.bf16.vlgmr.msra.gmra.mxu2 %vm902_vm6, %v999_v50 }
 0x401   : > { %v1878_v49 = vpop.eup %1877 }
 0x402   : > { %v1065_v54 = vmul.f32 %v1878_v49, %v1870_v34  ;;  %v1127_v55 = vpop.xlane.xlu1 %1126  ;;  %v1728_v49 = vld [vmem:[%s2422_s14 + $0x8] sm:$0xff] }
 0x403   : > { %1879 = vrcp.f32 %v1127_v55 }
 0x404   : > { %v1066_v58 = vpack.c.bf16 %v1065_v54, %v1065_v54 }
 0x409   : > { %v1880_v60 = vpop.eup %1879 }
 0x40a   : > { %v951_v52 = vpop.f32.mrf.mxu0  ;;  %v1129_v61 = vmul.f32 %v1880_v60, %v1874_v40 }
 0x40b   : > { %v955_v53 = vpack.c.bf16 %v951_v52, %v951_v52  ;;  %v1727_v52 = vld [vmem:[%s2422_s14] sm:$0xff] }
 0x40c   : > { %v1130_v0 = vpack.c.bf16 %v1129_v61, %v1129_v61 }
 0x40d   : > { %957 = vst.msk [vmem:[#allocation2] sm:$0xf] %vm956_vm9, %v955_v53  ;;  %v1068_v56 = vpop.permute.xlu0 %1067  ;;  %v1859_v53 = vld [vmem:[%s745_s23] ss:$0 sm:$0xff]  ;;  %s1364_s23 = sshll.u32 %s2426_s25, 4  ;;  %s1365_s23 = int_to_ptr.vmem [resolvable:$true] %s1364_s23 }
 0x40e   : > { %v1073_v57 = vsel %vm938_vm7, %v1068_v56, 0 }
 0x40f   : > { %1082 = vmatpush.bf16.msra.mxu0 %v1073_v57 }
 0x412   : > { %v953_v59 = vpop.f32.mrf.mxu0  ;;  %1654 = vmatmul.msk.bf16.vlgmr.msra.gmra.mxu0 %vm902_vm6, %v1066_v58 }
 0x413   : > { %1259 = vmatpush.bf16.msrb.mxu0 %v1726_v29  ;;  %v1860_v59 = vld [vmem:[%s753_s24] ss:$0 sm:$0xff] }
 0x41a   : > { %v1132_v62 = vpop.permute.xlu1 %1131 }
 0x41b   : > { %v1137_v63 = vsel %vm938_vm7, %v1132_v62, 0 }
 0x41c   : > { %1146 = vmatpush.bf16.msrb.mxu2 %v1137_v63 }
 0x41f   : > { %1656 = vmatmul.msk.bf16.vlgmr.msrb.gmra.mxu2 %vm902_vm6, %v1130_v0 }
 0x482   : > { %v1020_v2 = vpop.f32.mrf.mxu2 }
 0x483   : > { %v1024_v3 = vpack.c.bf16 %v1020_v2, %v1020_v2 }
 0x485   : > { %1026 = vrot.lane.b32.xlu2 %v1024_v3, %s2105_s22  ;;  %s1987_s22 = sshra.s32 %s1367_s7, 4  ;;  %s1988_s22 = int_to_ptr.hbm [resolvable:$true] %s1987_s22 }
 0x486   : > { %s1989_s20 = scalar_lea.hbm %s1988_s22, 8  ;;  %p1994_p5 = scmp.lt.s32.totalorder %s1988_s22, %s2698_s3 }
 0x487   : > { %p1990_p12 = scmp.ne.s32.totalorder %s1988_s22, %s1989_s20 }
 0x489   : > { %p1991_p3 = pnand %p1990_p12, %p2318_p0 }
 0x48a   : > { %v1022_v4 = vpop.f32.mrf.mxu2 }
 0x48b   : > { %p1992_p4 = pneg %p1991_p3 }
 0x48f   : > { %v1084_v5 = vpop.f32.mrf.mxu0 }
 0x490   : > { %v1088_v6 = vpack.c.bf16 %v1084_v5, %v1084_v5 }
 0x492   : > { %1090 = vrot.lane.b32.xlu2 %v1088_v6, %s2106_s13  ;;  %s1993_s13 = scalar_lea.hbm %s2698_s3, 16 }
 0x493   : > { %p1995_p6 = scmp.lt.s32.totalorder %s1993_s13, %s1989_s20 }
 0x495   : > { %p1996_p10 = por %p1995_p6, %p1994_p5 }
 0x497   : > { %v1086_v7 = vpop.f32.mrf.mxu0  ;;  %p1997_p11 = pnand %p1996_p10, %p1992_p4 }
 0x4a2   : > { %v1148_v8 = vpop.f32.mrf.mxu2 }
 0x4a3   : > { %v1152_v10 = vpack.c.bf16 %v1148_v8, %v1148_v8 }
 0x4a5   : > { %1154 = vrot.lane.b32.xlu0 %v1152_v10, %s2107_s16 }
 0x4aa   : > { %v1150_v11 = vpop.f32.mrf.mxu2 }
 0x4df   : > { %v1027_v12 = vpop.permute.xlu2 %1026 }
 0x4e0   : > { %1030 = vst.msk [vmem:[#allocation2] sm:$0xf] %vm1029_vm10, %v1027_v12 }
 0x4ec   : > { %v1091_v13 = vpop.permute.xlu2 %1090 }
 0x4ed   : > { %1094 = vst.msk [vmem:[#allocation2] sm:$0xf] %vm1093_vm11, %v1091_v13 }
 0x517   : > { %v1155_v16 = vpop.permute.xlu0 %1154 }
 0x518   : > { %1158 = vst.msk [vmem:[#allocation2] sm:$0xf] %vm1157_vm12, %v1155_v16 }
 0x51f   : > { %v1159_v17 = vld [vmem:[#allocation2] sm:$0xf] }
 0x520   : > { %1665 = vmatmul.msk.bf16.vlgmr.msra.gmra.mxu3 %vm765_vm1, %v1159_v17 }
 0x5a3   : > { %v1192_v19 = vpop.f32.mrf.mxu3 }
 0x5a4   : > { %v1193_v20 = vadd.f32 %v1856_v18, %v1192_v19 }
 0x5a6   : > { %v2506_v21 = vadd.f32 %v1193_v20, %v2431_v1  ;;  %v1725_v1 = vld [vmem:[%s2408_s30] sm:$0xff] }
 0x5a7   : > { %1260 = vmatpush.bf16.msrb.mxu0 %v1725_v1 }
 0x5a8   : > { %v1199_v22 = vsel %vm765_vm1, %v2506_v21, 0.0 }
 0x5a9   : > { %1200 = vadd.xlane.f32.xlu1 %v1199_v22 }
 0x5ab   : > { %v1194_v23 = vpop.f32.mrf.mxu3 }
 0x61c   : > { %v1201_v24 = vpop.xlane.xlu1 %1200 }
 0x61d   : > { %v1202_v25 = vmul.f32 %v1201_v24, %v2435_v9 }
 0x61f   : > { %v1203_v26 = vsub.f32 %v2506_v21, %v1202_v25 }
 0x621   : > { %v1204_v27 = vmul.f32 %v1203_v26, %v1203_v26 }
 0x623   : > { %v1205_v28 = vsel %vm765_vm1, %v1204_v27, 0.0 }
 0x624   : > { %1206 = vadd.xlane.f32.xlu2 %v1205_v28 }
 0x697   : > { %v1207_v31 = vpop.xlane.xlu2 %1206 }
 0x698   : > { %v1208_v32 = vmul.f32 %v1207_v31, %v2435_v9  ;;  %v1729_v9 = vld [vmem:[%s2422_s14 + $0x10] sm:$0xff] }
 0x699   : > { %1341 = vmatpush.bf16.msra.mxu1 %v1729_v9 }
 0x69a   : > { %v1209_v34 = vadd.f32 1e-05, %v1208_v32 }
 0x69c   : > { %1881 = vrsqrt.f32 %v1209_v34  ;;  %vm1216_vm14 = vweird.f32 %v1209_v34 }
 0x69d   : > { %1342 = vmatpush.bf16.msra.mxu1 %v1728_v49 }
 0x6a1   : > { %1343 = vmatpush.bf16.msra.mxu1 %v1727_v52 }
 0x6a2   : > { %v1882_v37 = vpop.eup %1881 }
 0x6a3   : > { %v1211_v38 = vmul.f32 %v1882_v37, %v1209_v34  ;;  %vm1217_vm13 = vweird.f32 %v1882_v37 }
 0x6a4   : > { %vm1218_vm15 = vmor %vm1216_vm14, %vm1217_vm13 }
 0x6a5   : > { %v1212_v40 = vmul.f32 %v1882_v37, %v1211_v38 }
 0x6a7   : > { %v1213_v41 = vmul.f32 0.5, %v1212_v40 }
 0x6a9   : > { %v1214_v42 = vsub.f32 1.5, %v1213_v41 }
 0x6ab   : > { %v1215_v43 = vmul.f32 %v1882_v37, %v1214_v42 }
 0x6ad   : > { %v1219_v45 = vsel %vm1218_vm15, %v1882_v37, %v1215_v43 }
 0x6ae   : > { %v1220_v46 = vmul.f32 %v1219_v45, %v1203_v26 }
 0x6b0   : > { %v1224_v48 = vmul.f32 %v1857_v44, %v1220_v46 }
 0x6b2   : > { %v1228_v50 = vadd.f32 %v1858_v47, %v1224_v48 }
 0x6b4   : > { %v1229_v51 = vpack.c.bf16 %v1228_v50, %v1228_v50 }
 0x6b6   : > { %1674 = vmatmul.msk.bf16.vlgmr.msrb.gmra.mxu0 %vm765_vm1, %v1229_v51 }
 0x733   : > { %v1262_v54 = vpop.f32.mrf.mxu0 }
 0x734   : > { %v1263_v55 = vadd.f32 %v1859_v53, %v1262_v54 }
 0x736   : > { %v1266_v56 = vmax.f32 %v1263_v55, 0.0 }
 0x738   : > { %v1267_v57 = vpack.c.bf16 %v1266_v56, %v1266_v56 }
 0x73a   : > { %1344 = vmatmul.bf16.vlgmr.msra.gmra.mxu1 %v1267_v57 }
 0x73b   : > { %v1264_v58 = vpop.f32.mrf.mxu0 }
 0x7b7   : > { %v1345_v60 = vpop.f32.mrf.mxu1 }
 0x7b8   : > { %v1346_v61 = vadd.f32 %v1860_v59, %v1345_v60 }
 0x7ba   : > { %v1349_v62 = vadd.f32 %v1346_v61, %v2506_v21 }
 0x7bc   : > { %1350 = vst.msk [vmem:[%s2426_s25] sm:$0xff] %vm765_vm1, %v1349_v62 }
 0x7bd   : > { %2000 = shalt.err (!%p1997_p11)
}
 0x7be   : > { %1741 = dma.vmem_to_hbm [thread:$0]  (%p2318_p0), %s1365_s23, 128, %s1367_s7, %s1352_s18  }
 0x7bf   : > { %v1347_v63 = vpop.f32.mrf.mxu1 }
 0x7c0 PF: > { %s2699_s25 = sld [smem:[#allocation21_spill]] }
 0x7c1   : > { %s2700_s29 = sld [smem:[#allocation15_spill]] }
 0x7c6   : > { %p1758_p1 = scmp.ge.s32.totalorder %s2699_s25, 2 }
 0x7c7   : > { %s1378_s2 = sand.u32 1, %s2700_s29  }
 0x7c8   : > { %p1754_p2 = pnand %p1758_p1, %p2325_p8  ;;  %s1379_s30 = scalar_lea.sflag [#allocation5], %s1378_s2 }
 0x7ca   : > { %p1755_p13 = pneg %p1754_p2 }
 0x7cc   : > { %2054 = dma.done.wait (%p1755_p13), %s1379_s30, 128  }
 0x7cd   : > { %2056 = vsyncadd (%p1755_p13), %s1379_s30, 4294967168  ;;  %s33_s23 = sadd.s32 1, %s2699_s25   ;;  %s2702_s29 = sld [smem:[#allocation13_spill]] }
 0x7ce   : > { %p30_p9 = scmp.ge.s32.totalorder %s33_s23, 6   ;;  %s2703_s30 = sld [smem:[#allocation14_spill]] }
 0x7cf   : > { %s2704_s15 = sld [smem:[#allocation23_spill]] }
 0x7d0   : > { %s2705_s16 = sld [smem:[#allocation16_spill]] }
 0x7d1   : > { %s2706_s17 = sld [smem:[#allocation17_spill]] }
 0x7d2   : > { %s2707_s18 = sld [smem:[#allocation27_spill]]  ;;  %32 = sbr.rel (!%p30_p9) target bundleno = 27 (0x1b), region = 182 }
 0x7d3   : > { %s2708_s19 = sld [smem:[#allocation19_spill]] }
 0x7d4   : > { %s2709_s20 = sld [smem:[#allocation20_spill]] }
 0x7d5   : > { %s2710_s21 = sld [smem:[#allocation22_spill]] }
 0x7d6   : > { %s2711_s22 = sld [smem:[#allocation24_spill]] }
 0x7d7   :  { %1385 = vsyncpa [#allocation4], 1 }
 0x7d8   :  { %1387 = vsyncpa [#allocation4 + $0x1], 1 }
 0x7d9   :  { %1388 = vsyncpa [#allocation7], 1 }
 0x7da   :  { %1390 = vsyncpa [#allocation7 + $0x1], 1 }
 0x7db   :  { %1391 = vsyncpa [#allocation5], 1 }
 0x7dc   :  { %1393 = vsyncpa [#allocation5 + $0x1], 1 }

</bundles_post_ra>
